<compile_context>
chip_gen: v7x
topology: tpu7x:2x2x1
jax: 0.10.0
libtpu: 0.0.40
codegen_flags: <defaults>
</compile_context>

<pallas_src>
import functools

import jax
import jax.numpy as jnp
from jax.experimental import pallas as pl
from jax.experimental.pallas import tpu as pltpu

_LANE = 128


def _round_up(n, m):
    return (n + m - 1) // m * m


def _elu(h):
    # torch.nn.ELU(alpha=1.0): h if h > 0 else exp(h) - 1
    return jnp.where(h > 0, h, jnp.exp(jnp.minimum(h, 0.0)) - 1.0)


def _statnet_kernel(x_ref, n1_ref, n2_ref, n3_ref,
                    w1_ref, b1_ref, w2_ref, b2_ref, w3_ref, b3_ref,
                    o_ref, *, stds, matmul_dtype):
    """Whole-MLP fusion: noise add -> L1 -> ELU -> noise -> L2 -> ELU -> noise -> L3."""
    h = x_ref[...]
    if stds[0] != 0.0:
        h = h + stds[0] * n1_ref[...]
    h = jnp.dot(h.astype(matmul_dtype), w1_ref[...],
                preferred_element_type=jnp.float32) + b1_ref[...]
    h = _elu(h)

    if stds[1] != 0.0:
        h = h + stds[1] * n2_ref[...]
    h = jnp.dot(h.astype(matmul_dtype), w2_ref[...],
                preferred_element_type=jnp.float32) + b2_ref[...]
    h = _elu(h)

    if stds[2] != 0.0:
        h = h + stds[2] * n3_ref[...]
    # Lane-dense (padded-to-128) output tile: full-width unmasked stores.
    o_ref[...] = jnp.dot(h.astype(matmul_dtype), w3_ref[...],
                         preferred_element_type=jnp.float32) + b3_ref[...]


def prepare_params(params, *, matmul_dtype=jnp.bfloat16):
    """One-time weight prep: transpose to [in, out], pad to full lanes, cast.

    Do this once per training step (or cache it); it is NOT in the hot path.
    params: (w1 [512, in], b1 [512], w2 [512, 512], b2 [512], w3 [1, 512], b3 [1])
            in the PyTorch nn.Linear [out, in] layout.
    """
    w1, b1, w2, b2, w3, b3 = params
    hidden = w1.shape[0]
    in_dim = w1.shape[1]
    out_dim = w3.shape[0]
    in_pad = _round_up(in_dim, _LANE)
    out_pad = _round_up(out_dim, _LANE)

    # [in, out] layout (native [M,K]x[K,N] contraction), zero-padded, MXU dtype.
    w1t = jnp.pad(w1.T, ((0, in_pad - in_dim), (0, 0))).astype(matmul_dtype)   # [in_pad, 512]
    w2t = w2.T.astype(matmul_dtype)                                            # [512, 512]
    w3t = jnp.pad(w3.T, ((0, 0), (0, out_pad - out_dim))).astype(matmul_dtype) # [512, out_pad]
    b1r = b1.reshape(1, hidden).astype(jnp.float32)
    b2r = b2.reshape(1, hidden).astype(jnp.float32)
    b3r = jnp.pad(b3, (0, out_pad - out_dim)).reshape(1, out_pad).astype(jnp.float32)

    dims = (in_dim, in_pad, hidden, out_dim, out_pad)
    return (w1t, b1r, w2t, b2r, w3t, b3r), dims


def statistics_network_forward(x, prepared, key, *, stds=(0.3, 0.5, 0.5), tm=512):
    """Forward pass of StatisticsNetwork.

    x:        [B, x_dim + z_dim] float32
    prepared: output of prepare_params(params)
    key:      jax.random key for the GaussianLayer noise
    stds:     static noise stds of the three GaussianLayers (module default 0.3/0.5/0.5)
    returns   [B, 1] float32
    """
    (w1t, b1r, w2t, b2r, w3t, b3r), (in_dim, in_pad, hidden, out_dim, out_pad) = prepared
    B = x.shape[0]
    stds = tuple(float(s) for s in stds)

    # Batch tiling: tm rows per grid step; weights stay VMEM-resident while
    # x / noise / out stream through the pipeline.
    tm = min(tm, _round_up(B, 8))
    # Megacore (v7x): keep >=2 grid steps when the batch allows so the
    # "parallel" axis can be sharded across both TensorCores.
    if B >= 16 and _round_up(B, tm) // tm < 2:
        tm = _round_up((B + 1) // 2, 8)
    Bp = _round_up(B, tm)

    if Bp != B or in_pad != in_dim:
        x = jnp.pad(x, ((0, Bp - B), (0, in_pad - in_dim)))

    # Gaussian noise (statistically equivalent to torch.randn_like streams).
    def _noise(k, shape, std):
        if std == 0.0:
            return jnp.zeros(shape, jnp.float32)
        return jax.random.normal(k, shape, jnp.float32)

    k1, k2, k3 = jax.random.split(key, 3)
    n1 = _noise(k1, (Bp, in_pad), stds[0])
    n2 = _noise(k2, (Bp, hidden), stds[1])
    n3 = _noise(k3, (Bp, hidden), stds[2])

    kernel = functools.partial(_statnet_kernel, stds=stds, matmul_dtype=w1t.dtype)

    out = pl.pallas_call(
        kernel,
        out_shape=jax.ShapeDtypeStruct((Bp, out_pad), jnp.float32),
        grid=(Bp // tm,),
        in_specs=[
            pl.BlockSpec((tm, in_pad),     lambda i: (i, 0)),  # x tile streams
            pl.BlockSpec((tm, in_pad),     lambda i: (i, 0)),  # n1 streams
            pl.BlockSpec((tm, hidden),     lambda i: (i, 0)),  # n2 streams
            pl.BlockSpec((tm, hidden),     lambda i: (i, 0)),  # n3 streams
            pl.BlockSpec((in_pad, hidden), lambda i: (0, 0)),  # w1^T resident
            pl.BlockSpec((1, hidden),      lambda i: (0, 0)),  # b1 resident
            pl.BlockSpec((hidden, hidden), lambda i: (0, 0)),  # w2^T resident
            pl.BlockSpec((1, hidden),      lambda i: (0, 0)),  # b2 resident
            pl.BlockSpec((hidden, out_pad), lambda i: (0, 0)), # w3^T (padded) resident
            pl.BlockSpec((1, out_pad),     lambda i: (0, 0)),  # b3 (padded) resident
        ],
        out_specs=pl.BlockSpec((tm, out_pad), lambda i: (i, 0)),
        compiler_params=pltpu.CompilerParams(
            dimension_semantics=("parallel",),      # batch axis megacore-shardable
        ),
    )(x, n1, n2, n3, w1t, b1r, w2t, b2r, w3t, b3r)

    return out[:B, :out_dim]


if __name__ == "__main__":
    # Small shapes consistent with the module: x_dim + z_dim input, 512 hidden, 1 output.
    B = 8
    x_dim, z_dim = 20, 12
    in_dim = x_dim + z_dim
    hidden, out_dim = 512, 1

    key = jax.random.PRNGKey(0)
    kx, k1, kb1, k2, kb2, k3, kb3 = jax.random.split(key, 7)

    def _init_linear(kw, kb, fan_out, fan_in):
        bound = 1.0 / (fan_in ** 0.5)
        w = jax.random.uniform(kw, (fan_out, fan_in), jnp.float32, -bound, bound)
        b = jax.random.uniform(kb, (fan_out,), jnp.float32, -bound, bound)
        return w, b

    w1, b1 = _init_linear(k1, kb1, hidden, in_dim)
    w2, b2 = _init_linear(k2, kb2, hidden, hidden)
    w3, b3 = _init_linear(k3, kb3, out_dim, hidden)
    params = (w1, b1, w2, b2, w3, b3)

    x = jax.random.normal(kx, (B, in_dim), dtype=jnp.float32)

    # (1) Deterministic correctness check: f32 matmul path, noise disabled,
    #     compared against a plain-JAX reference.
    prep_f32 = prepare_params(params, matmul_dtype=jnp.float32)
    y_nonoise = statistics_network_forward(
        x, prep_f32, jax.random.PRNGKey(1), stds=(0.0, 0.0, 0.0))
    jax.block_until_ready(y_nonoise)

    def _elu_ref(h):
        return jnp.where(h > 0, h, jnp.exp(jnp.minimum(h, 0.0)) - 1.0)

    with jax.default_matmul_precision("highest"):
        h = _elu_ref(x @ w1.T + b1)
        h = _elu_ref(h @ w2.T + b2)
        ref = h @ w3.T + b3

    assert y_nonoise.shape == (B, out_dim)
    assert jnp.allclose(y_nonoise, ref, atol=2e-3, rtol=2e-3), (
        float(jnp.max(jnp.abs(y_nonoise - ref))))

    # (2) Full forward with the module's noise stds (0.3, 0.5, 0.5) on the
    #     bf16-MXU / f32-accumulate fast path.
    prep_bf16 = prepare_params(params)   # bf16 matmul operands (MXU-native)
    y = statistics_network_forward(x, prep_bf16, jax.random.PRNGKey(2))
    jax.block_until_ready(y)
    assert y.shape == (B, out_dim)
    assert bool(jnp.all(jnp.isfinite(y)))

    print("KERNEL_OK")
</pallas_src>

<mosaic_0001>
module attributes {stable_mosaic.version = 11 : i64} {
  func.func @_statnet_kernel(%arg0: i32, %arg1: memref<8x128xf32, #tpu.memory_space<vmem>>, %arg2: memref<8x128xf32, #tpu.memory_space<vmem>>, %arg3: memref<8x512xf32, #tpu.memory_space<vmem>>, %arg4: memref<8x512xf32, #tpu.memory_space<vmem>>, %arg5: memref<128x512xf32, #tpu.memory_space<vmem>>, %arg6: memref<1x512xf32, #tpu.memory_space<vmem>>, %arg7: memref<512x512xf32, #tpu.memory_space<vmem>>, %arg8: memref<1x512xf32, #tpu.memory_space<vmem>>, %arg9: memref<512x128xf32, #tpu.memory_space<vmem>>, %arg10: memref<1x128xf32, #tpu.memory_space<vmem>>, %arg11: memref<8x128xf32, #tpu.memory_space<vmem>>) attributes {dimension_semantics = [#tpu.dimension_semantics<parallel>], iteration_bounds = array<i64: 1>, scalar_prefetch = 0 : i64, scratch_operands = 0 : i64, tpu.core_type = #tpu.core_type<tc>, window_params = [{transform_indices = @transform_0, window_bounds = array<i64: 8, 128>}, {transform_indices = @transform_1, window_bounds = array<i64: 8, 128>}, {transform_indices = @transform_2, window_bounds = array<i64: 8, 512>}, {transform_indices = @transform_3, window_bounds = array<i64: 8, 512>}, {pipeline_mode = #tpu.pipeline_mode<synchronous>, transform_indices = @transform_4, window_bounds = array<i64: 128, 512>}, {pipeline_mode = #tpu.pipeline_mode<synchronous>, transform_indices = @transform_5, window_bounds = array<i64: 1, 512>}, {pipeline_mode = #tpu.pipeline_mode<synchronous>, transform_indices = @transform_6, window_bounds = array<i64: 512, 512>}, {pipeline_mode = #tpu.pipeline_mode<synchronous>, transform_indices = @transform_7, window_bounds = array<i64: 1, 512>}, {pipeline_mode = #tpu.pipeline_mode<synchronous>, transform_indices = @transform_8, window_bounds = array<i64: 512, 128>}, {pipeline_mode = #tpu.pipeline_mode<synchronous>, transform_indices = @transform_9, window_bounds = array<i64: 1, 128>}, {transform_indices = @transform_10, window_bounds = array<i64: 8, 128>}]} {
    %c0 = arith.constant 0 : index
    %c0_0 = arith.constant 0 : index
    %0 = vector.load %arg1[%c0, %c0_0] : memref<8x128xf32, #tpu.memory_space<vmem>>, vector<8x128xf32>
    %c0_1 = arith.constant 0 : index
    %c0_2 = arith.constant 0 : index
    %1 = vector.load %arg5[%c0_1, %c0_2] : memref<128x512xf32, #tpu.memory_space<vmem>>, vector<128x512xf32>
    %cst = arith.constant dense<0.000000e+00> : vector<8x512xf32>
    %2 = tpu.matmul %0, %1, %cst {dimension_numbers = #tpu.dot_dimension_numbers<[1], [0], [0], [1], [0, 0, 1, 1], [], []>} : vector<8x128xf32>, vector<128x512xf32>, vector<8x512xf32> -> vector<8x512xf32>
    %c0_3 = arith.constant 0 : index
    %c0_4 = arith.constant 0 : index
    %3 = vector.load %arg6[%c0_3, %c0_4] : memref<1x512xf32, #tpu.memory_space<vmem>>, vector<1x512xf32>
    %4 = vector.broadcast %3 : vector<1x512xf32> to vector<8x512xf32>
    %5 = arith.addf %2, %4 : vector<8x512xf32>
    %cst_5 = arith.constant 0.000000e+00 : f32
    %6 = vector.broadcast %cst_5 : f32 to vector<8x512xf32>
    %7 = arith.cmpf ogt, %5, %6 : vector<8x512xf32>
    %cst_6 = arith.constant 0.000000e+00 : f32
    %8 = vector.broadcast %cst_6 : f32 to vector<8x512xf32>
    %9 = arith.minimumf %5, %8 : vector<8x512xf32>
    %10 = math.exp %9 : vector<8x512xf32>
    %cst_7 = arith.constant 1.000000e+00 : f32
    %11 = vector.broadcast %cst_7 : f32 to vector<8x512xf32>
    %12 = arith.subf %10, %11 : vector<8x512xf32>
    %13 = arith.select %7, %5, %12 : vector<8x512xi1>, vector<8x512xf32>
    %c0_8 = arith.constant 0 : index
    %c0_9 = arith.constant 0 : index
    %14 = vector.load %arg7[%c0_8, %c0_9] : memref<512x512xf32, #tpu.memory_space<vmem>>, vector<512x512xf32>
    %cst_10 = arith.constant dense<0.000000e+00> : vector<8x512xf32>
    %15 = tpu.matmul %13, %14, %cst_10 {dimension_numbers = #tpu.dot_dimension_numbers<[1], [0], [0], [1], [0, 0, 1, 1], [], []>} : vector<8x512xf32>, vector<512x512xf32>, vector<8x512xf32> -> vector<8x512xf32>
    %c0_11 = arith.constant 0 : index
    %c0_12 = arith.constant 0 : index
    %16 = vector.load %arg8[%c0_11, %c0_12] : memref<1x512xf32, #tpu.memory_space<vmem>>, vector<1x512xf32>
    %17 = vector.broadcast %16 : vector<1x512xf32> to vector<8x512xf32>
    %18 = arith.addf %15, %17 : vector<8x512xf32>
    %cst_13 = arith.constant 0.000000e+00 : f32
    %19 = vector.broadcast %cst_13 : f32 to vector<8x512xf32>
    %20 = arith.cmpf ogt, %18, %19 : vector<8x512xf32>
    %cst_14 = arith.constant 0.000000e+00 : f32
    %21 = vector.broadcast %cst_14 : f32 to vector<8x512xf32>
    %22 = arith.minimumf %18, %21 : vector<8x512xf32>
    %23 = math.exp %22 : vector<8x512xf32>
    %cst_15 = arith.constant 1.000000e+00 : f32
    %24 = vector.broadcast %cst_15 : f32 to vector<8x512xf32>
    %25 = arith.subf %23, %24 : vector<8x512xf32>
    %26 = arith.select %20, %18, %25 : vector<8x512xi1>, vector<8x512xf32>
    %c0_16 = arith.constant 0 : index
    %c0_17 = arith.constant 0 : index
    %27 = vector.load %arg9[%c0_16, %c0_17] : memref<512x128xf32, #tpu.memory_space<vmem>>, vector<512x128xf32>
    %cst_18 = arith.constant dense<0.000000e+00> : vector<8x128xf32>
    %28 = tpu.matmul %26, %27, %cst_18 {dimension_numbers = #tpu.dot_dimension_numbers<[1], [0], [0], [1], [0, 0, 1, 1], [], []>} : vector<8x512xf32>, vector<512x128xf32>, vector<8x128xf32> -> vector<8x128xf32>
    %c0_19 = arith.constant 0 : index
    %c0_20 = arith.constant 0 : index
    %29 = vector.load %arg10[%c0_19, %c0_20] : memref<1x128xf32, #tpu.memory_space<vmem>>, vector<1x128xf32>
    %30 = vector.broadcast %29 : vector<1x128xf32> to vector<8x128xf32>
    %31 = arith.addf %28, %30 : vector<8x128xf32>
    %c0_21 = arith.constant 0 : index
    %c0_22 = arith.constant 0 : index
    %32 = vector.load %arg11[%c0_21, %c0_22] : memref<8x128xf32, #tpu.memory_space<vmem>>, vector<8x128xf32>
    tpu.vector_store %arg11[%c0_21, %c0_22], %31 {strides = array<i32>} : memref<8x128xf32, #tpu.memory_space<vmem>>, vector<8x128xf32>,
    return
  }
  func.func @transform_0(%arg0: i32) -> (i32, i32) {
    %c0_i32 = arith.constant 0 : i32
    %c0_i32_0 = arith.constant 0 : i32
    return %arg0, %c0_i32 : i32, i32
  }
  func.func @transform_1(%arg0: i32) -> (i32, i32) {
    %c0_i32 = arith.constant 0 : i32
    %c0_i32_0 = arith.constant 0 : i32
    return %arg0, %c0_i32 : i32, i32
  }
  func.func @transform_2(%arg0: i32) -> (i32, i32) {
    %c0_i32 = arith.constant 0 : i32
    %c0_i32_0 = arith.constant 0 : i32
    return %arg0, %c0_i32 : i32, i32
  }
  func.func @transform_3(%arg0: i32) -> (i32, i32) {
    %c0_i32 = arith.constant 0 : i32
    %c0_i32_0 = arith.constant 0 : i32
    return %arg0, %c0_i32 : i32, i32
  }
  func.func @transform_4(%arg0: i32) -> (i32, i32) {
    %c0_i32 = arith.constant 0 : i32
    %c0_i32_0 = arith.constant 0 : i32
    %c0_i32_1 = arith.constant 0 : i32
    return %c0_i32, %c0_i32_0 : i32, i32
  }
  func.func @transform_5(%arg0: i32) -> (i32, i32) {
    %c0_i32 = arith.constant 0 : i32
    %c0_i32_0 = arith.constant 0 : i32
    %c0_i32_1 = arith.constant 0 : i32
    return %c0_i32, %c0_i32_0 : i32, i32
  }
  func.func @transform_6(%arg0: i32) -> (i32, i32) {
    %c0_i32 = arith.constant 0 : i32
    %c0_i32_0 = arith.constant 0 : i32
    %c0_i32_1 = arith.constant 0 : i32
    return %c0_i32, %c0_i32_0 : i32, i32
  }
  func.func @transform_7(%arg0: i32) -> (i32, i32) {
    %c0_i32 = arith.constant 0 : i32
    %c0_i32_0 = arith.constant 0 : i32
    %c0_i32_1 = arith.constant 0 : i32
    return %c0_i32, %c0_i32_0 : i32, i32
  }
  func.func @transform_8(%arg0: i32) -> (i32, i32) {
    %c0_i32 = arith.constant 0 : i32
    %c0_i32_0 = arith.constant 0 : i32
    %c0_i32_1 = arith.constant 0 : i32
    return %c0_i32, %c0_i32_0 : i32, i32
  }
  func.func @transform_9(%arg0: i32) -> (i32, i32) {
    %c0_i32 = arith.constant 0 : i32
    %c0_i32_0 = arith.constant 0 : i32
    %c0_i32_1 = arith.constant 0 : i32
    return %c0_i32, %c0_i32_0 : i32, i32
  }
  func.func @transform_10(%arg0: i32) -> (i32, i32) {
    %c0_i32 = arith.constant 0 : i32
    %c0_i32_0 = arith.constant 0 : i32
    return %arg0, %c0_i32 : i32, i32
  }
}

</mosaic_0001>

<bundles_post_ra>
// kernel: tpu_custom_call.1
= control target key start
LH: loop header
LB: loop body
LE: loop exit
PB: predicated region body
PF: predicated region fallthrough
CT: control target
= control target key end

     0   :  { %15 = vsyncpa [#allocation3], 0  ;;  %s2109_s0 = inlined_call_operand.hbm [shape: f32[8,128], index: 0, kind: input, shape index: {}]   ;;  %s2110_s1 = inlined_call_operand.hbm [shape: f32[8,128], index: 1, kind: input, shape index: {}]   ;;  %s2111_s2 = inlined_call_operand.hbm [shape: f32[8,512], index: 2, kind: input, shape index: {}]   ;;  %s2112_s3 = inlined_call_operand.hbm [shape: f32[8,512], index: 3, kind: input, shape index: {}]   ;;  %s2113_s4 = inlined_call_operand.hbm [shape: f32[128,512], index: 4, kind: input, shape index: {}]   ;;  %s2114_s5 = inlined_call_operand.vmem [shape: f32[1,512], index: 5, kind: input, shape index: {}]   ;;  %s2115_s6 = inlined_call_operand.hbm [shape: f32[512,512], index: 6, kind: input, shape index: {}]   ;;  %s2116_s7 = inlined_call_operand.vmem [shape: f32[1,512], index: 7, kind: input, shape index: {}]   ;;  %s2117_s8 = inlined_call_operand.hbm [shape: f32[512,128], index: 8, kind: input, shape index: {}]   ;;  %s2118_s9 = inlined_call_operand.vmem [shape: f32[1,128], index: 9, kind: input, shape index: {}]   ;;  %s2119_s10 = inlined_call_operand.hbm [shape: f32[8,128], index: 10, kind: output, shape index: {}]  }
   0x1   :  { %16 = vsyncpa [#allocation6], 0 }
   0x2   :  { %17 = vsyncpa [#allocation9], 0 }
   0x3   :  { %18 = vsyncpa [#allocation12], 0 }
   0x4   :  { %19 = vsyncpa [#allocation4], 0  ;;  %s1878_s13 = smov [#allocation5]   ;;  %s1879_s15 = smov [#allocation8]  }
   0x5   :  { %s36_s14 = sshll.u32 %s1878_s13, 4  ;;  %s56_s16 = sshll.u32 %s1879_s15, 4  ;;  %s37_s14 = int_to_ptr.vmem [resolvable:$true] %s36_s14  ;;  %s57_s16 = int_to_ptr.vmem [resolvable:$true] %s56_s16 }
   0x6   :  { %s1692_s19 = scalar_lea.hbm %s2110_s1, 128 }
   0x7   :  { %p1693_p0 = scmp.ne.s32.totalorder %s2110_s1, %s1692_s19  ;;  %p1696_p1 = scmp.lt.u32.totalorder %s1692_s19, %s2110_s1 }
   0x9   :  { %p1698_p2 = pnand %p1696_p1, %p1693_p0 }
   0xb   :  { %1701 = shalt.err (!%p1698_p2)
}
   0xc   :  { %s1702_s24 = scalar_lea.vmem %s37_s14, 128  ;;  %p1707_p4 = scmp.lt.s32.totalorder %s37_s14, %s37_s14 }
   0xd   :  { %p1703_p3 = scmp.ne.s32.totalorder %s37_s14, %s1702_s24  ;;  %p1708_p5 = scmp.lt.s32.totalorder %s1702_s24, %s1702_s24 }
   0xf   :  { %p1709_p6 = por %p1708_p5, %p1707_p4 }
  0x11   :  { %p1710_p7 = pnand %p1709_p6, %p1703_p3 }
  0x13   :  { %1713 = shalt.err (!%p1710_p7)
}
  0x14   :  { %39 = dma.hbm_to_vmem [thread:$0]  %s2110_s1, 128, %s37_s14, [#allocation6]  }
  0x15   :  { %s1714_s29 = scalar_lea.hbm %s2112_s3, 512 }
  0x16   :  { %p1715_p8 = scmp.ne.s32.totalorder %s2112_s3, %s1714_s29  ;;  %p1718_p9 = scmp.lt.u32.totalorder %s1714_s29, %s2112_s3 }
  0x18   :  { %p1720_p10 = pnand %p1718_p9, %p1715_p8 }
  0x1a   :  { %1723 = shalt.err (!%p1720_p10)
}
  0x1b   :  { %s1724_s15 = scalar_lea.vmem %s57_s16, 512  ;;  %p1729_p12 = scmp.lt.s32.totalorder %s57_s16, %s57_s16 }
  0x1c   :  { %p1725_p11 = scmp.ne.s32.totalorder %s57_s16, %s1724_s15  ;;  %p1730_p13 = scmp.lt.s32.totalorder %s1724_s15, %s1724_s15 }
  0x1e   :  { %p1731_p0 = por %p1730_p13, %p1729_p12 }
  0x20   :  { %p1732_p1 = pnand %p1731_p0, %p1725_p11 }
  0x22   :  { %1735 = shalt.err (!%p1732_p1)
}
  0x23   :  { %59 = dma.hbm_to_vmem [thread:$0]  %s2112_s3, 512, %s57_s16, [#allocation9]  }
  0x24   :  { %s1880_s17 = smov [#allocation11]   ;;  %s1881_s19 = smov [#allocation2]  }
  0x25   :  { %s79_s18 = sshll.u32 %s1880_s17, 4  ;;  %s26_s20 = sshll.u32 %s1881_s19, 4  ;;  %s80_s18 = int_to_ptr.vmem [resolvable:$true] %s79_s18  ;;  %s27_s20 = int_to_ptr.vmem [resolvable:$true] %s26_s20 }
  0x26   :  { %s1736_s23 = scalar_lea.hbm %s2115_s6, 32768 }
  0x27   :  { %p1737_p2 = scmp.ne.s32.totalorder %s2115_s6, %s1736_s23  ;;  %p1740_p3 = scmp.lt.u32.totalorder %s1736_s23, %s2115_s6 }
  0x29   :  { %p1742_p4 = pnand %p1740_p3, %p1737_p2 }
  0x2b   :  { %1745 = shalt.err (!%p1742_p4)
}
  0x2c   :  { %s1746_s3 = scalar_lea.vmem %s80_s18, 32768  ;;  %p1751_p6 = scmp.lt.s32.totalorder %s80_s18, %s80_s18 }
  0x2d   :  { %p1747_p5 = scmp.ne.s32.totalorder %s80_s18, %s1746_s3  ;;  %p1752_p7 = scmp.lt.s32.totalorder %s1746_s3, %s1746_s3 }
  0x2f   :  { %p1753_p8 = por %p1752_p7, %p1751_p6 }
  0x31   :  { %p1754_p9 = pnand %p1753_p8, %p1747_p5 }
  0x33   :  { %1757 = shalt.err (!%p1754_p9)
}
  0x34   :  { %s1882_s16 = smov 512   ;;  %s1883_s28 = smov 32  }
  0x35   :  { %85 = dma.hbm_to_vmem [thread:$0]  %s2115_s6, 32768, %s80_s18, [#allocation12], %s1882_s16, %s1882_s16, %s1883_s28  }
  0x36   :  { %s1758_s13 = scalar_lea.hbm %s2109_s0, 128 }
  0x37   :  { %p1759_p10 = scmp.ne.s32.totalorder %s2109_s0, %s1758_s13  ;;  %p1762_p11 = scmp.lt.u32.totalorder %s1758_s13, %s2109_s0 }
  0x39   :  { %p1764_p12 = pnand %p1762_p11, %p1759_p10 }
  0x3b   :  { %1767 = shalt.err (!%p1764_p12)
}
  0x3c   :  { %s1768_s19 = scalar_lea.vmem %s27_s20, 128  ;;  %p1773_p0 = scmp.lt.s32.totalorder %s27_s20, %s27_s20 }
  0x3d   :  { %p1769_p13 = scmp.ne.s32.totalorder %s27_s20, %s1768_s19  ;;  %p1774_p1 = scmp.lt.s32.totalorder %s1768_s19, %s1768_s19 }
  0x3f   :  { %p1775_p2 = por %p1774_p1, %p1773_p0 }
  0x41   :  { %p1776_p3 = pnand %p1775_p2, %p1769_p13 }
  0x43   :  { %1779 = shalt.err (!%p1776_p3)
}
  0x44   :  { %29 = dma.hbm_to_vmem [thread:$0]  %s2109_s0, 128, %s27_s20, [#allocation3]  }
  0x45   :  { %s1884_s21 = smov [#allocation7]   ;;  %s1885_s23 = smov [#allocation10]  }
  0x46   :  { %s46_s22 = sshll.u32 %s1884_s21, 4  ;;  %s65_s24 = sshll.u32 %s1885_s23, 4  ;;  %s47_s22 = int_to_ptr.vmem [resolvable:$true] %s46_s22  ;;  %s1997_s24 = int_to_ptr.vmem [resolvable:$true] %s65_s24 }
  0x47   :  { %s1780_s27 = scalar_lea.hbm %s2111_s2, 512 }
  0x48   :  { %p1781_p4 = scmp.ne.s32.totalorder %s2111_s2, %s1780_s27  ;;  %p1784_p5 = scmp.lt.u32.totalorder %s1780_s27, %s2111_s2 }
  0x4a   :  { %p1786_p6 = pnand %p1784_p5, %p1781_p4 }
  0x4c   :  { %1789 = shalt.err (!%p1786_p6)
}
  0x4d   :  { %s1790_s0 = scalar_lea.vmem %s47_s22, 512  ;;  %p1795_p8 = scmp.lt.s32.totalorder %s47_s22, %s47_s22 }
  0x4e   :  { %p1791_p7 = scmp.ne.s32.totalorder %s47_s22, %s1790_s0  ;;  %p1796_p9 = scmp.lt.s32.totalorder %s1790_s0, %s1790_s0 }
  0x50   :  { %p1797_p10 = por %p1796_p9, %p1795_p8 }
  0x52   :  { %p1798_p11 = pnand %p1797_p10, %p1791_p7 }
  0x54   :  { %1801 = shalt.err (!%p1798_p11)
}
  0x55   :  { %49 = dma.hbm_to_vmem [thread:$0]  %s2111_s2, 512, %s47_s22, [#allocation6]  }
  0x56   :  { %s1802_s1 = scalar_lea.hbm %s2113_s4, 8192 }
  0x57   :  { %p1803_p12 = scmp.ne.s32.totalorder %s2113_s4, %s1802_s1  ;;  %p1806_p13 = scmp.lt.u32.totalorder %s1802_s1, %s2113_s4 }
  0x59   :  { %p1808_p0 = pnand %p1806_p13, %p1803_p12 }
  0x5b   :  { %1811 = shalt.err (!%p1808_p0)
}
  0x5c   :  { %s1812_s18 = scalar_lea.vmem %s1997_s24, 8192  ;;  %p1817_p2 = scmp.lt.s32.totalorder %s1997_s24, %s1997_s24 }
  0x5d   :  { %p1813_p1 = scmp.ne.s32.totalorder %s1997_s24, %s1812_s18  ;;  %p1818_p3 = scmp.lt.s32.totalorder %s1812_s18, %s1812_s18 }
  0x5f   :  { %p1819_p4 = por %p1818_p3, %p1817_p2 }
  0x61   :  { %p1820_p5 = pnand %p1819_p4, %p1813_p1 }
  0x63   :  { %1823 = shalt.err (!%p1820_p5)
}
  0x64   :  { %71 = dma.hbm_to_vmem [thread:$0]  %s2113_s4, 8192, %s1997_s24, [#allocation9], %s1882_s16, %s1882_s16, %s1883_s28  }
  0x65   :  { %s1886_s22 = smov [#allocation13]   ;;  %s1824_s27 = scalar_lea.hbm %s2117_s8, 8192 }
  0x66   :  { %s93_s23 = sshll.u32 %s1886_s22, 4  ;;  %p1825_p6 = scmp.ne.s32.totalorder %s2117_s8, %s1824_s27  ;;  %s94_s23 = int_to_ptr.vmem [resolvable:$true] %s93_s23 }
  0x67   :  { %p1828_p7 = scmp.lt.u32.totalorder %s1824_s27, %s2117_s8 }
  0x69   :  { %p1830_p8 = pnand %p1828_p7, %p1825_p6 }
  0x6b   :  { %1833 = shalt.err (!%p1830_p8)
}
  0x6c   :  { %s1834_s0 = scalar_lea.vmem %s94_s23, 8192  ;;  %p1839_p10 = scmp.lt.s32.totalorder %s94_s23, %s94_s23 }
  0x6d   :  { %p1835_p9 = scmp.ne.s32.totalorder %s94_s23, %s1834_s0  ;;  %p1840_p11 = scmp.lt.s32.totalorder %s1834_s0, %s1834_s0 }
  0x6f   :  { %p1841_p12 = por %p1840_p11, %p1839_p10 }
  0x71   :  { %p1842_p13 = pnand %p1841_p12, %p1835_p9 }
  0x73   :  { %1845 = shalt.err (!%p1842_p13)
}
  0x74   :  { %s1887_s4 = smov 128   ;;  %s1888_s16 = smov 8  }
  0x75   :  { %99 = dma.hbm_to_vmem [thread:$0]  %s2117_s8, 8192, %s94_s23, [#allocation12], %s1887_s4, %s1887_s4, %s1888_s16  }
  0x76   :  { %1868 = dma.done.wait [#allocation3], 128  }
  0x77   :  { %1869 = vsyncadd [#allocation3], 4294967168 }
  0x78   :  { %1870 = dma.done.wait [#allocation6], 640  }
  0x79   :  { %1871 = vsyncadd [#allocation6], 4294966656 }
  0x7a   :  { %1872 = dma.done.wait [#allocation9], 8704  }
  0x7b   :  { %1873 = vsyncadd [#allocation9], 4294958592 }
  0x7c   :  { %1874 = dma.done.wait [#allocation12], 40960  }
  0x7d   :  { %1875 = vsyncadd [#allocation12], 4294926336  ;;  %v1889_v0 = vmov 0.0   ;;  %v125_v1 = vld [vmem:[#allocation10 + $0x8] sm:$0xff]  ;;  %v124_v3 = vld [vmem:[#allocation10] sm:$0xff]  ;;  %s1890_s15 = smov [#allocation14]  }
  0x7e   :  { %274 = vmatprep.mubr.f32.mxu0 %v1889_v0  ;;  %345 = vmatprep.mubr.f32.mxu1 %v1889_v0  ;;  %v129_v2 = vld [vmem:[#allocation10 + $0x28] sm:$0xff]  ;;  %v128_v5 = vld [vmem:[#allocation10 + $0x20] sm:$0xff]  ;;  %v127_v28 = vld [vmem:[#allocation10 + $0x18] sm:$0xff]  ;;  %s1180_s1 = sshll.u32 %s1890_s15, 4  ;;  %s1181_s1 = int_to_ptr.vmem [resolvable:$true] %s1180_s1 }
  0x7f   :  { %v1271_v4 = vpack.c.bf16 %v129_v2, %v125_v1  ;;  %v133_v6 = vld [vmem:[#allocation10 + $0x48] sm:$0xff]  ;;  %v1273_v8 = vpack.c.bf16 %v128_v5, %v124_v3  ;;  %v132_v10 = vld [vmem:[#allocation10 + $0x40] sm:$0xff]  ;;  %v131_v29 = vld [vmem:[#allocation10 + $0x38] sm:$0xff]  ;;  %s1846_s14 = scalar_lea.vmem %s1181_s1, 128  ;;  %p1851_p1 = scmp.lt.s32.totalorder %s1181_s1, %s1181_s1 }
  0x80   :  { %v137_v7 = vld [vmem:[#allocation10 + $0x68] sm:$0xff]  ;;  %v136_v11 = vld [vmem:[#allocation10 + $0x60] sm:$0xff]  ;;  %v126_v30 = vld [vmem:[#allocation10 + $0x10] sm:$0xff]  ;;  %v1303_v32 = vpack.c.bf16 %v131_v29, %v127_v28  ;;  %p1847_p0 = scmp.ne.s32.totalorder %s1181_s1, %s1846_s14  ;;  %p1852_p2 = scmp.lt.s32.totalorder %s1846_s14, %s1846_s14 }
  0x81   :  { %v1275_v9 = vpack.c.bf16 %v137_v7, %v133_v6  ;;  %v141_v12 = vld [vmem:[#allocation10 + $0x88] sm:$0xff]  ;;  %1272 = vmatprep.subr.bf16.mxu0 %v1271_v4  ;;  %v1277_v14 = vpack.c.bf16 %v136_v11, %v132_v10  ;;  %v140_v16 = vld [vmem:[#allocation10 + $0x80] sm:$0xff]  ;;  %v130_v33 = vld [vmem:[#allocation10 + $0x30] sm:$0xff] }
  0x82   :  { %v145_v13 = vld [vmem:[#allocation10 + $0xa8] sm:$0xff]  ;;  %1274 = vmatpush1.bf16.msra.mxu0 %v1273_v8  ;;  %v144_v17 = vld [vmem:[#allocation10 + $0xa0] sm:$0xff]  ;;  %v135_v34 = vld [vmem:[#allocation10 + $0x58] sm:$0xff]  ;;  %v1305_v37 = vpack.c.bf16 %v130_v33, %v126_v30  ;;  %1304 = vmatprep.subr.bf16.mxu1 %v1303_v32  ;;  %p1853_p3 = por %p1852_p2, %p1851_p1 }
  0x83   :  { %1276 = vmatprep.subr.bf16.mxu0 %v1275_v9  ;;  %v1279_v15 = vpack.c.bf16 %v145_v13, %v141_v12  ;;  %v149_v18 = vld [vmem:[#allocation10 + $0xc8] sm:$0xff]  ;;  %v1281_v20 = vpack.c.bf16 %v144_v17, %v140_v16  ;;  %v148_v22 = vld [vmem:[#allocation10 + $0xc0] sm:$0xff]  ;;  %v139_v35 = vld [vmem:[#allocation10 + $0x78] sm:$0xff] }
  0x84   :  { %v153_v19 = vld [vmem:[#allocation10 + $0xe8] sm:$0xff]  ;;  %v152_v23 = vld [vmem:[#allocation10 + $0xe0] sm:$0xff]  ;;  %v1307_v38 = vpack.c.bf16 %v139_v35, %v135_v34  ;;  %v134_v39 = vld [vmem:[#allocation10 + $0x50] sm:$0xff]  ;;  %1306 = vmatpush1.bf16.msra.mxu1 %v1305_v37  ;;  %p1854_p4 = pnand %p1853_p3, %p1847_p0 }
  0x85   :  { %v1283_v21 = vpack.c.bf16 %v153_v19, %v149_v18  ;;  %v157_v24 = vld [vmem:[#allocation10 + $0x108] sm:$0xff]  ;;  %v156_v26 = vld [vmem:[#allocation10 + $0x100] sm:$0xff]  ;;  %v1285_v31 = vpack.c.bf16 %v152_v23, %v148_v22  ;;  %v138_v40 = vld [vmem:[#allocation10 + $0x70] sm:$0xff] }
  0x86   :  { %1278 = vmatpush1.bf16.msra.mxu0 %v1277_v14  ;;  %v161_v25 = vld [vmem:[#allocation10 + $0x128] sm:$0xff]  ;;  %v160_v27 = vld [vmem:[#allocation10 + $0x120] sm:$0xff]  ;;  %v143_v41 = vld [vmem:[#allocation10 + $0x98] sm:$0xff]  ;;  %v1309_v45 = vpack.c.bf16 %v138_v40, %v134_v39  ;;  %1308 = vmatprep.subr.bf16.mxu1 %v1307_v38 }
  0x87   :  { %1280 = vmatprep.subr.bf16.mxu0 %v1279_v15  ;;  %v1287_v36 = vpack.c.bf16 %v161_v25, %v157_v24  ;;  %v165_v42 = vld [vmem:[#allocation10 + $0x148] sm:$0xff]  ;;  %v147_v44 = vld [vmem:[#allocation10 + $0xb8] sm:$0xff]  ;;  %v1289_v46 = vpack.c.bf16 %v160_v27, %v156_v26  ;;  %v164_v47 = vld [vmem:[#allocation10 + $0x140] sm:$0xff] }
  0x88   :  { %v169_v43 = vld [vmem:[#allocation10 + $0x168] sm:$0xff]  ;;  %v1311_v48 = vpack.c.bf16 %v147_v44, %v143_v41  ;;  %v142_v49 = vld [vmem:[#allocation10 + $0x90] sm:$0xff]  ;;  %v168_v52 = vld [vmem:[#allocation10 + $0x160] sm:$0xff]  ;;  %1310 = vmatpush1.bf16.msra.mxu1 %v1309_v45 }
  0x89   :  { %v146_v50 = vld [vmem:[#allocation10 + $0xb0] sm:$0xff]  ;;  %v1291_v51 = vpack.c.bf16 %v169_v43, %v165_v42  ;;  %v151_v53 = vld [vmem:[#allocation10 + $0xd8] sm:$0xff]  ;;  %v173_v55 = vld [vmem:[#allocation10 + $0x188] sm:$0xff]  ;;  %v1293_v58 = vpack.c.bf16 %v168_v52, %v164_v47 }
  0x8a   :  { %1282 = vmatpush1.bf16.msra.mxu0 %v1281_v20  ;;  %v155_v54 = vld [vmem:[#allocation10 + $0xf8] sm:$0xff]  ;;  %v177_v56 = vld [vmem:[#allocation10 + $0x1a8] sm:$0xff]  ;;  %v1313_v57 = vpack.c.bf16 %v146_v50, %v142_v49  ;;  %v172_v59 = vld [vmem:[#allocation10 + $0x180] sm:$0xff]  ;;  %1312 = vmatprep.subr.bf16.mxu1 %v1311_v48 }
  0x8b   :  { %1284 = vmatprep.subr.bf16.mxu0 %v1283_v21  ;;  %v1315_v60 = vpack.c.bf16 %v155_v54, %v151_v53  ;;  %v150_v61 = vld [vmem:[#allocation10 + $0xd0] sm:$0xff]  ;;  %v1295_v63 = vpack.c.bf16 %v177_v56, %v173_v55  ;;  %v176_v0 = vld [vmem:[#allocation10 + $0x1a0] sm:$0xff]  ;;  %v159_v1 = vld [vmem:[#allocation10 + $0x118] sm:$0xff] }
  0x8c   :  { %v154_v62 = vld [vmem:[#allocation10 + $0xf0] sm:$0xff]  ;;  %v163_v2 = vld [vmem:[#allocation10 + $0x138] sm:$0xff]  ;;  %v181_v3 = vld [vmem:[#allocation10 + $0x1c8] sm:$0xff]  ;;  %1314 = vmatpush1.bf16.msra.mxu1 %v1313_v57  ;;  %v1297_v6 = vpack.c.bf16 %v176_v0, %v172_v59 }
  0x8d   :  { %v185_v4 = vld [vmem:[#allocation10 + $0x1e8] sm:$0xff]  ;;  %v1317_v5 = vpack.c.bf16 %v154_v62, %v150_v61  ;;  %v180_v7 = vld [vmem:[#allocation10 + $0x1c0] sm:$0xff]  ;;  %1316 = vmatprep.subr.bf16.mxu1 %v1315_v60  ;;  %v1319_v8 = vpack.c.bf16 %v163_v2, %v159_v1  ;;  %v158_v9 = vld [vmem:[#allocation10 + $0x110] sm:$0xff] }
  0x8e   :  { %1286 = vmatpush1.bf16.msra.mxu0 %v1285_v31  ;;  %v162_v10 = vld [vmem:[#allocation10 + $0x130] sm:$0xff]  ;;  %v1299_v11 = vpack.c.bf16 %v185_v4, %v181_v3  ;;  %v184_v12 = vld [vmem:[#allocation10 + $0x1e0] sm:$0xff]  ;;  %v167_v13 = vld [vmem:[#allocation10 + $0x158] sm:$0xff] }
  0x8f   :  { %1288 = vmatprep.subr.bf16.mxu0 %v1287_v36  ;;  %v171_v14 = vld [vmem:[#allocation10 + $0x178] sm:$0xff]  ;;  %v377_v15 = vld [vmem:[#allocation11 + $0x8] sm:$0xff]  ;;  %v1321_v17 = vpack.c.bf16 %v162_v10, %v158_v9  ;;  %v1301_v18 = vpack.c.bf16 %v184_v12, %v180_v7  ;;  %v166_v20 = vld [vmem:[#allocation10 + $0x150] sm:$0xff] }
  0x90   :  { %v381_v16 = vld [vmem:[#allocation11 + $0x28] sm:$0xff]  ;;  %1318 = vmatpush1.bf16.msra.mxu1 %v1317_v5  ;;  %v1323_v19 = vpack.c.bf16 %v171_v14, %v167_v13  ;;  %v170_v21 = vld [vmem:[#allocation10 + $0x170] sm:$0xff]  ;;  %v175_v22 = vld [vmem:[#allocation10 + $0x198] sm:$0xff] }
  0x91   :  { %1320 = vmatprep.subr.bf16.mxu1 %v1319_v8  ;;  %v179_v23 = vld [vmem:[#allocation10 + $0x1b8] sm:$0xff]  ;;  %v1335_v24 = vpack.c.bf16 %v381_v16, %v377_v15  ;;  %v376_v25 = vld [vmem:[#allocation11] sm:$0xff]  ;;  %v385_v27 = vld [vmem:[#allocation11 + $0x48] sm:$0xff]  ;;  %v1325_v30 = vpack.c.bf16 %v170_v21, %v166_v20 }
  0x92   :  { %1290 = vmatpush1.bf16.msra.mxu0 %v1289_v46  ;;  %v380_v26 = vld [vmem:[#allocation11 + $0x20] sm:$0xff]  ;;  %v389_v28 = vld [vmem:[#allocation11 + $0x68] sm:$0xff]  ;;  %v2043_v29 = vld [vmem:[#allocation2] sm:$0xff]  ;;  %v1327_v31 = vpack.c.bf16 %v179_v23, %v175_v22 }
  0x93   :  { %1292 = vmatprep.subr.bf16.mxu0 %v1291_v51  ;;  %v174_v32 = vld [vmem:[#allocation10 + $0x190] sm:$0xff]  ;;  %v183_v34 = vld [vmem:[#allocation10 + $0x1d8] sm:$0xff]  ;;  %v1337_v35 = vpack.c.bf16 %v380_v26, %v376_v25  ;;  %v1339_v37 = vpack.c.bf16 %v389_v28, %v385_v27  ;;  %v384_v38 = vld [vmem:[#allocation11 + $0x40] sm:$0xff] }
  0x94   :  { %1322 = vmatpush1.bf16.msra.mxu1 %v1321_v17  ;;  %v178_v33 = vld [vmem:[#allocation10 + $0x1b0] sm:$0xff]  ;;  %v187_v36 = vld [vmem:[#allocation10 + $0x1f8] sm:$0xff]  ;;  %v388_v39 = vld [vmem:[#allocation11 + $0x60] sm:$0xff] }
  0x95   :  { %1324 = vmatprep.subr.bf16.mxu1 %v1323_v19  ;;  %v393_v40 = vld [vmem:[#allocation11 + $0x88] sm:$0xff]  ;;  %v1329_v42 = vpack.c.bf16 %v178_v33, %v174_v32  ;;  %v1331_v43 = vpack.c.bf16 %v187_v36, %v183_v34  ;;  %v182_v44 = vld [vmem:[#allocation10 + $0x1d0] sm:$0xff]  ;;  %v379_v46 = vld [vmem:[#allocation11 + $0x18] sm:$0xff]  ;;  %v1341_v47 = vpack.c.bf16 %v388_v39, %v384_v38 }
  0x96   :  { %1294 = vmatpush1.bf16.msra.mxu0 %v1293_v58  ;;  %v397_v41 = vld [vmem:[#allocation11 + $0xa8] sm:$0xff]  ;;  %v186_v45 = vld [vmem:[#allocation10 + $0x1f0] sm:$0xff]  ;;  %v383_v48 = vld [vmem:[#allocation11 + $0x38] sm:$0xff] }
  0x97   :  { %1296 = vmatprep.subr.bf16.mxu0 %v1295_v63  ;;  %v1343_v49 = vpack.c.bf16 %v397_v41, %v393_v40  ;;  %v392_v50 = vld [vmem:[#allocation11 + $0x80] sm:$0xff]  ;;  %v401_v52 = vld [vmem:[#allocation11 + $0xc8] sm:$0xff]  ;;  %v1333_v54 = vpack.c.bf16 %v186_v45, %v182_v44  ;;  %v1463_v55 = vpack.c.bf16 %v383_v48, %v379_v46  ;;  %v378_v56 = vld [vmem:[#allocation11 + $0x10] sm:$0xff] }
  0x98   :  { %1326 = vmatpush1.bf16.msra.mxu1 %v1325_v30  ;;  %v396_v51 = vld [vmem:[#allocation11 + $0xa0] sm:$0xff]  ;;  %v405_v53 = vld [vmem:[#allocation11 + $0xe8] sm:$0xff]  ;;  %v382_v57 = vld [vmem:[#allocation11 + $0x30] sm:$0xff] }
  0x99   :  { %1328 = vmatprep.subr.bf16.mxu1 %v1327_v31  ;;  %v387_v58 = vld [vmem:[#allocation11 + $0x58] sm:$0xff]  ;;  %v1345_v59 = vpack.c.bf16 %v396_v51, %v392_v50  ;;  %v1347_v61 = vpack.c.bf16 %v405_v53, %v401_v52  ;;  %v400_v62 = vld [vmem:[#allocation11 + $0xc0] sm:$0xff]  ;;  %v409_v0 = vld [vmem:[#allocation11 + $0x108] sm:$0xff]  ;;  %v1465_v2 = vpack.c.bf16 %v382_v57, %v378_v56 }
  0x9a   :  { %1298 = vmatpush1.bf16.msra.mxu0 %v1297_v6  ;;  %v391_v60 = vld [vmem:[#allocation11 + $0x78] sm:$0xff]  ;;  %v404_v63 = vld [vmem:[#allocation11 + $0xe0] sm:$0xff]  ;;  %v413_v1 = vld [vmem:[#allocation11 + $0x128] sm:$0xff] }
  0x9b   :  { %1300 = vmatprep.subr.bf16.mxu0 %v1299_v11  ;;  %v1467_v3 = vpack.c.bf16 %v391_v60, %v387_v58  ;;  %v386_v4 = vld [vmem:[#allocation11 + $0x50] sm:$0xff]  ;;  %v395_v6 = vld [vmem:[#allocation11 + $0x98] sm:$0xff]  ;;  %v1349_v7 = vpack.c.bf16 %v404_v63, %v400_v62  ;;  %v1351_v9 = vpack.c.bf16 %v413_v1, %v409_v0  ;;  %v408_v10 = vld [vmem:[#allocation11 + $0x100] sm:$0xff] }
  0x9c   :  { %1330 = vmatpush1.bf16.msra.mxu1 %v1329_v42  ;;  %v390_v5 = vld [vmem:[#allocation11 + $0x70] sm:$0xff]  ;;  %v399_v8 = vld [vmem:[#allocation11 + $0xb8] sm:$0xff]  ;;  %v412_v11 = vld [vmem:[#allocation11 + $0x120] sm:$0xff] }
  0x9d   :  { %1332 = vmatprep.subr.bf16.mxu1 %v1331_v43  ;;  %v417_v12 = vld [vmem:[#allocation11 + $0x148] sm:$0xff]  ;;  %v1469_v14 = vpack.c.bf16 %v390_v5, %v386_v4  ;;  %v1471_v15 = vpack.c.bf16 %v399_v8, %v395_v6  ;;  %v394_v16 = vld [vmem:[#allocation11 + $0x90] sm:$0xff]  ;;  %v1353_v19 = vpack.c.bf16 %v412_v11, %v408_v10  ;;  %v407_v20 = vld [vmem:[#allocation11 + $0xf8] sm:$0xff] }
  0x9e   :  { %1302 = vmatpush1.bf16.msra.mxu0 %v1301_v18  ;;  %v421_v13 = vld [vmem:[#allocation11 + $0x168] sm:$0xff]  ;;  %v398_v17 = vld [vmem:[#allocation11 + $0xb0] sm:$0xff]  ;;  %v403_v18 = vld [vmem:[#allocation11 + $0xd8] sm:$0xff] }
  0x9f   :  { %1336 = vmatprep.subr.bf16.mxu0 %v1335_v24  ;;  %v1355_v21 = vpack.c.bf16 %v421_v13, %v417_v12  ;;  %v416_v22 = vld [vmem:[#allocation11 + $0x140] sm:$0xff]  ;;  %v425_v24 = vld [vmem:[#allocation11 + $0x188] sm:$0xff]  ;;  %v1473_v26 = vpack.c.bf16 %v398_v17, %v394_v16  ;;  %v1475_v27 = vpack.c.bf16 %v407_v20, %v403_v18  ;;  %v402_v28 = vld [vmem:[#allocation11 + $0xd0] sm:$0xff] }
  0xa0   :  { %1334 = vmatpush1.bf16.msra.mxu1 %v1333_v54  ;;  %v420_v23 = vld [vmem:[#allocation11 + $0x160] sm:$0xff]  ;;  %v429_v25 = vld [vmem:[#allocation11 + $0x1a8] sm:$0xff]  ;;  %v411_v30 = vld [vmem:[#allocation11 + $0x118] sm:$0xff] }
  0xa1   :  { %275 = vmatmul.mubr.f32.vlgmr.msra.gmra.mrb[0].mxu0 %v2043_v29  ;;  %1464 = vmatprep.subr.bf16.mxu1 %v1463_v55  ;;  %v1357_v31 = vpack.c.bf16 %v420_v23, %v416_v22  ;;  %v415_v32 = vld [vmem:[#allocation11 + $0x138] sm:$0xff]  ;;  %v1359_v33 = vpack.c.bf16 %v429_v25, %v425_v24  ;;  %v424_v34 = vld [vmem:[#allocation11 + $0x180] sm:$0xff]  ;;  %v433_v36 = vld [vmem:[#allocation11 + $0x1c8] sm:$0xff] }
  0xa2   :  { %1338 = vmatpush1.bf16.msra.mxu0 %v1337_v35  ;;  %v428_v35 = vld [vmem:[#allocation11 + $0x1a0] sm:$0xff]  ;;  %v1479_v39 = vpack.c.bf16 %v415_v32, %v411_v30  ;;  %v410_v40 = vld [vmem:[#allocation11 + $0x110] sm:$0xff]  ;;  %v419_v42 = vld [vmem:[#allocation11 + $0x158] sm:$0xff] }
  0xa3   :  { %1340 = vmatprep.subr.bf16.mxu0 %v1339_v37  ;;  %346 = vmatmul.mubr.f32.vlgmr.msra.gmra.mrb[0].mxu1 %v2043_v29  ;;  %v406_v29 = vld [vmem:[#allocation11 + $0xf0] sm:$0xff]  ;;  %v437_v37 = vld [vmem:[#allocation11 + $0x1e8] sm:$0xff]  ;;  %v1361_v43 = vpack.c.bf16 %v428_v35, %v424_v34  ;;  %v423_v44 = vld [vmem:[#allocation11 + $0x178] sm:$0xff] }
  0xa4   :  { %1466 = vmatpush1.bf16.msra.mxu1 %v1465_v2  ;;  %v1477_v38 = vpack.c.bf16 %v406_v29, %v402_v28  ;;  %v414_v41 = vld [vmem:[#allocation11 + $0x130] sm:$0xff]  ;;  %v1363_v45 = vpack.c.bf16 %v437_v37, %v433_v36  ;;  %v432_v46 = vld [vmem:[#allocation11 + $0x1c0] sm:$0xff]  ;;  %v441_v48 = vld [vmem:[#allocation11 + $0x208] sm:$0xff]  ;;  %v1483_v51 = vpack.c.bf16 %v423_v44, %v419_v42 }
  0xa5   :  { %1468 = vmatprep.subr.bf16.mxu1 %v1467_v3  ;;  %v1481_v50 = vpack.c.bf16 %v414_v41, %v410_v40  ;;  %v418_v52 = vld [vmem:[#allocation11 + $0x150] sm:$0xff]  ;;  %v427_v54 = vld [vmem:[#allocation11 + $0x198] sm:$0xff]  ;;  %v440_v58 = vld [vmem:[#allocation11 + $0x200] sm:$0xff] }
  0xa6   :  { %1342 = vmatpush1.bf16.msra.mxu0 %v1341_v47  ;;  %v436_v47 = vld [vmem:[#allocation11 + $0x1e0] sm:$0xff]  ;;  %v422_v53 = vld [vmem:[#allocation11 + $0x170] sm:$0xff]  ;;  %v431_v56 = vld [vmem:[#allocation11 + $0x1b8] sm:$0xff] }
  0xa7   :  { %1344 = vmatprep.subr.bf16.mxu0 %v1343_v49  ;;  %v445_v49 = vld [vmem:[#allocation11 + $0x228] sm:$0xff]  ;;  %v1365_v55 = vpack.c.bf16 %v436_v47, %v432_v46  ;;  %v1485_v62 = vpack.c.bf16 %v422_v53, %v418_v52  ;;  %v1487_v63 = vpack.c.bf16 %v431_v56, %v427_v54  ;;  %v426_v0 = vld [vmem:[#allocation11 + $0x190] sm:$0xff]  ;;  %v435_v2 = vld [vmem:[#allocation11 + $0x1d8] sm:$0xff] }
  0xa8   :  { %1470 = vmatpush1.bf16.msra.mxu1 %v1469_v14  ;;  %v1367_v57 = vpack.c.bf16 %v445_v49, %v441_v48  ;;  %v449_v60 = vld [vmem:[#allocation11 + $0x248] sm:$0xff]  ;;  %v430_v1 = vld [vmem:[#allocation11 + $0x1b0] sm:$0xff]  ;;  %v439_v4 = vld [vmem:[#allocation11 + $0x1f8] sm:$0xff] }
  0xa9   :  { %1472 = vmatprep.subr.bf16.mxu1 %v1471_v15  ;;  %v448_v6 = vld [vmem:[#allocation11 + $0x240] sm:$0xff]  ;;  %v457_v8 = vld [vmem:[#allocation11 + $0x288] sm:$0xff]  ;;  %v1489_v10 = vpack.c.bf16 %v430_v1, %v426_v0  ;;  %v1491_v11 = vpack.c.bf16 %v439_v4, %v435_v2  ;;  %v434_v12 = vld [vmem:[#allocation11 + $0x1d0] sm:$0xff] }
  0xaa   :  { %1346 = vmatpush1.bf16.msra.mxu0 %v1345_v59  ;;  %v444_v59 = vld [vmem:[#allocation11 + $0x220] sm:$0xff]  ;;  %v438_v13 = vld [vmem:[#allocation11 + $0x1f0] sm:$0xff]  ;;  %v443_v14 = vld [vmem:[#allocation11 + $0x218] sm:$0xff] }
  0xab   :  { %1348 = vmatprep.subr.bf16.mxu0 %v1347_v61  ;;  %v453_v61 = vld [vmem:[#allocation11 + $0x268] sm:$0xff]  ;;  %v1369_v3 = vpack.c.bf16 %v444_v59, %v440_v58  ;;  %v447_v16 = vld [vmem:[#allocation11 + $0x238] sm:$0xff]  ;;  %v456_v18 = vld [vmem:[#allocation11 + $0x280] sm:$0xff]  ;;  %v1493_v20 = vpack.c.bf16 %v438_v13, %v434_v12 }
  0xac   :  { %1474 = vmatpush1.bf16.msra.mxu1 %v1473_v26  ;;  %v1371_v5 = vpack.c.bf16 %v453_v61, %v449_v60  ;;  %v442_v22 = vld [vmem:[#allocation11 + $0x210] sm:$0xff]  ;;  %v451_v25 = vld [vmem:[#allocation11 + $0x258] sm:$0xff]  ;;  %v468_v44 = vld [vmem:[#allocation11 + $0x2e0] sm:$0xff] }
  0xad   :  { %1476 = vmatprep.subr.bf16.mxu1 %v1475_v27  ;;  %v446_v23 = vld [vmem:[#allocation11 + $0x230] sm:$0xff]  ;;  %v455_v26 = vld [vmem:[#allocation11 + $0x278] sm:$0xff]  ;;  %v476_v56 = vld [vmem:[#allocation11 + $0x320] sm:$0xff] }
  0xae   :  { %1350 = vmatpush1.bf16.msra.mxu0 %v1349_v7  ;;  %v452_v7 = vld [vmem:[#allocation11 + $0x260] sm:$0xff]  ;;  %v1497_v27 = vpack.c.bf16 %v446_v23, %v442_v22  ;;  %v1499_v28 = vpack.c.bf16 %v455_v26, %v451_v25  ;;  %v450_v29 = vld [vmem:[#allocation11 + $0x250] sm:$0xff]  ;;  %v463_v32 = vld [vmem:[#allocation11 + $0x2b8] sm:$0xff] }
  0xaf   :  { %1352 = vmatprep.subr.bf16.mxu0 %v1351_v9  ;;  %v461_v9 = vld [vmem:[#allocation11 + $0x2a8] sm:$0xff]  ;;  %v1373_v15 = vpack.c.bf16 %v452_v7, %v448_v6  ;;  %v454_v30 = vld [vmem:[#allocation11 + $0x270] sm:$0xff]  ;;  %v467_v40 = vld [vmem:[#allocation11 + $0x2d8] sm:$0xff] }
  0xb0   :  { %1478 = vmatpush1.bf16.msra.mxu1 %v1477_v38  ;;  %v1375_v17 = vpack.c.bf16 %v461_v9, %v457_v8  ;;  %v458_v35 = vld [vmem:[#allocation11 + $0x290] sm:$0xff]  ;;  %v465_v38 = vld [vmem:[#allocation11 + $0x2c8] sm:$0xff]  ;;  %v471_v42 = vld [vmem:[#allocation11 + $0x2f8] sm:$0xff] }
  0xb1   :  { %1480 = vmatprep.subr.bf16.mxu1 %v1479_v39  ;;  %v462_v36 = vld [vmem:[#allocation11 + $0x2b0] sm:$0xff]  ;;  %v469_v39 = vld [vmem:[#allocation11 + $0x2e8] sm:$0xff]  ;;  %v475_v52 = vld [vmem:[#allocation11 + $0x318] sm:$0xff] }
  0xb2   :  { %1354 = vmatpush1.bf16.msra.mxu0 %v1353_v19  ;;  %v460_v19 = vld [vmem:[#allocation11 + $0x2a0] sm:$0xff]  ;;  %v1505_v37 = vpack.c.bf16 %v462_v36, %v458_v35  ;;  %v1379_v41 = vpack.c.bf16 %v469_v39, %v465_v38  ;;  %v466_v47 = vld [vmem:[#allocation11 + $0x2d0] sm:$0xff]  ;;  %v479_v54 = vld [vmem:[#allocation11 + $0x338] sm:$0xff] }
  0xb3   :  { %1356 = vmatprep.subr.bf16.mxu0 %v1355_v21  ;;  %v1495_v21 = vpack.c.bf16 %v447_v16, %v443_v14  ;;  %v1377_v24 = vpack.c.bf16 %v460_v19, %v456_v18  ;;  %v470_v48 = vld [vmem:[#allocation11 + $0x2f0] sm:$0xff]  ;;  %v483_v0 = vld [vmem:[#allocation11 + $0x358] sm:$0xff]  ;;  %v484_v4 = vld [vmem:[#allocation11 + $0x360] sm:$0xff] }
  0xb4   :  { %1482 = vmatpush1.bf16.msra.mxu1 %v1481_v50  ;;  %v1509_v49 = vpack.c.bf16 %v470_v48, %v466_v47  ;;  %v473_v50 = vld [vmem:[#allocation11 + $0x308] sm:$0xff]  ;;  %v474_v59 = vld [vmem:[#allocation11 + $0x310] sm:$0xff]  ;;  %v487_v2 = vld [vmem:[#allocation11 + $0x378] sm:$0xff] }
  0xb5   :  { %1484 = vmatprep.subr.bf16.mxu1 %v1483_v51  ;;  %v477_v51 = vld [vmem:[#allocation11 + $0x328] sm:$0xff]  ;;  %v478_v60 = vld [vmem:[#allocation11 + $0x330] sm:$0xff]  ;;  %v491_v12 = vld [vmem:[#allocation11 + $0x398] sm:$0xff] }
  0xb6   :  { %1358 = vmatpush1.bf16.msra.mxu0 %v1357_v31  ;;  %v459_v31 = vld [vmem:[#allocation11 + $0x298] sm:$0xff]  ;;  %v1383_v53 = vpack.c.bf16 %v477_v51, %v473_v50  ;;  %v1513_v61 = vpack.c.bf16 %v478_v60, %v474_v59  ;;  %v482_v7 = vld [vmem:[#allocation11 + $0x350] sm:$0xff]  ;;  %v489_v9 = vld [vmem:[#allocation11 + $0x388] sm:$0xff] }
  0xb7   :  { %1360 = vmatprep.subr.bf16.mxu0 %v1359_v33  ;;  %v1501_v33 = vpack.c.bf16 %v454_v30, %v450_v29  ;;  %v1503_v34 = vpack.c.bf16 %v463_v32, %v459_v31  ;;  %v486_v8 = vld [vmem:[#allocation11 + $0x370] sm:$0xff]  ;;  %v495_v13 = vld [vmem:[#allocation11 + $0x3b8] sm:$0xff]  ;;  %v488_v16 = vld [vmem:[#allocation11 + $0x380] sm:$0xff] }
  0xb8   :  { %1486 = vmatpush1.bf16.msra.mxu1 %v1485_v62  ;;  %v481_v62 = vld [vmem:[#allocation11 + $0x348] sm:$0xff]  ;;  %v490_v18 = vld [vmem:[#allocation11 + $0x390] sm:$0xff]  ;;  %v499_v25 = vld [vmem:[#allocation11 + $0x3d8] sm:$0xff] }
  0xb9   :  { %1488 = vmatprep.subr.bf16.mxu1 %v1487_v63  ;;  %v485_v63 = vld [vmem:[#allocation11 + $0x368] sm:$0xff]  ;;  %v503_v26 = vld [vmem:[#allocation11 + $0x3f8] sm:$0xff]  ;;  %v500_v29 = vld [vmem:[#allocation11 + $0x3e0] sm:$0xff] }
  0xba   :  { %1362 = vmatpush1.bf16.msra.mxu0 %v1361_v43  ;;  %v464_v43 = vld [vmem:[#allocation11 + $0x2c0] sm:$0xff]  ;;  %v1387_v1 = vpack.c.bf16 %v485_v63, %v481_v62  ;;  %v501_v22 = vld [vmem:[#allocation11 + $0x3e8] sm:$0xff]  ;;  %v498_v30 = vld [vmem:[#allocation11 + $0x3d0] sm:$0xff] }
  0xbb   :  { %1364 = vmatprep.subr.bf16.mxu0 %v1363_v45  ;;  %v1507_v45 = vpack.c.bf16 %v471_v42, %v467_v40  ;;  %v1381_v46 = vpack.c.bf16 %v468_v44, %v464_v43  ;;  %v502_v31 = vld [vmem:[#allocation11 + $0x3f0] sm:$0xff]  ;;  %v509_v35 = vld [vmem:[#allocation11 + $0x428] sm:$0xff]  ;;  %v507_v36 = vld [vmem:[#allocation11 + $0x418] sm:$0xff]  ;;  %v190_v40 = vlaneseq }
  0xbc   :  { %1490 = vmatpush1.bf16.msra.mxu1 %v1489_v10  ;;  %v1517_v10 = vpack.c.bf16 %v486_v8, %v482_v7  ;;  %v511_v38 = vld [vmem:[#allocation11 + $0x438] sm:$0xff]  ;;  %v2053_v43 = vld [vmem:[%s2114_s5] sm:$0xf]  ;;  %v508_v62 = vld [vmem:[#allocation11 + $0x420] sm:$0xff] }
  0xbd   :  { %1492 = vmatprep.subr.bf16.mxu1 %v1491_v11  ;;  %v493_v11 = vld [vmem:[#allocation11 + $0x3a8] sm:$0xff]  ;;  %v1527_v39 = vpack.c.bf16 %v511_v38, %v507_v36  ;;  %v515_v7 = vld [vmem:[#allocation11 + $0x458] sm:$0xff]  ;;  %v528_v38 = vld [vmem:[#allocation11 + $0x4c0] sm:$0xff] }
  0xbe   :  { %1366 = vmatpush1.bf16.msra.mxu0 %v1365_v55  ;;  %v472_v55 = vld [vmem:[#allocation11 + $0x300] sm:$0xff]  ;;  %v1391_v14 = vpack.c.bf16 %v493_v11, %v489_v9  ;;  %v519_v8 = vld [vmem:[#allocation11 + $0x478] sm:$0xff] }
  0xbf   :  { %1368 = vmatprep.subr.bf16.mxu0 %v1367_v57  ;;  %v1511_v57 = vpack.c.bf16 %v479_v54, %v475_v52  ;;  %v1385_v58 = vpack.c.bf16 %v476_v56, %v472_v55 }
  0xc0   :  { %1494 = vmatpush1.bf16.msra.mxu1 %v1493_v20  ;;  %v494_v20 = vld [vmem:[#allocation11 + $0x3b0] sm:$0xff] }
  0xc1   :  { %1496 = vmatprep.subr.bf16.mxu1 %v1495_v21  ;;  %v497_v21 = vld [vmem:[#allocation11 + $0x3c8] sm:$0xff]  ;;  %v1521_v23 = vpack.c.bf16 %v494_v20, %v490_v18  ;;  %v518_v18 = vld [vmem:[#allocation11 + $0x470] sm:$0xff] }
  0xc2   :  { %1370 = vmatpush1.bf16.msra.mxu0 %v1369_v3  ;;  %v480_v3 = vld [vmem:[#allocation11 + $0x340] sm:$0xff] }
  0xc3   :  { %1372 = vmatprep.subr.bf16.mxu0 %v1371_v5  ;;  %v1515_v5 = vpack.c.bf16 %v487_v2, %v483_v0  ;;  %v1389_v6 = vpack.c.bf16 %v484_v4, %v480_v3  ;;  %v506_v0 = vld [vmem:[#allocation11 + $0x410] sm:$0xff]  ;;  %v513_v2 = vld [vmem:[#allocation11 + $0x448] sm:$0xff] }
  0xc4   :  { %1498 = vmatpush1.bf16.msra.mxu1 %v1497_v27  ;;  %v496_v27 = vld [vmem:[#allocation11 + $0x3c0] sm:$0xff] }
  0xc5   :  { %1500 = vmatprep.subr.bf16.mxu1 %v1499_v28  ;;  %v1523_v28 = vpack.c.bf16 %v503_v26, %v499_v25  ;;  %v1397_v32 = vpack.c.bf16 %v500_v29, %v496_v27  ;;  %v520_v26 = vld [vmem:[#allocation11 + $0x480] sm:$0xff] }
  0xc6   :  { %1374 = vmatpush1.bf16.msra.mxu0 %v1373_v15  ;;  %v1519_v15 = vpack.c.bf16 %v495_v13, %v491_v12  ;;  %v512_v12 = vld [vmem:[#allocation11 + $0x440] sm:$0xff] }
  0xc7   :  { %1376 = vmatprep.subr.bf16.mxu0 %v1375_v17  ;;  %v492_v17 = vld [vmem:[#allocation11 + $0x3a0] sm:$0xff] }
  0xc8   :  { %1502 = vmatpush1.bf16.msra.mxu1 %v1501_v33  ;;  %v1393_v19 = vpack.c.bf16 %v492_v17, %v488_v16  ;;  %v1525_v33 = vpack.c.bf16 %v502_v31, %v498_v30  ;;  %v516_v13 = vld [vmem:[#allocation11 + $0x460] sm:$0xff]  ;;  %v1531_v16 = vpack.c.bf16 %v519_v8, %v515_v7  ;;  %v514_v17 = vld [vmem:[#allocation11 + $0x450] sm:$0xff] }
  0xc9   :  { %1504 = vmatprep.subr.bf16.mxu1 %v1503_v34  ;;  %v505_v34 = vld [vmem:[#allocation11 + $0x408] sm:$0xff]  ;;  %v1533_v25 = vpack.c.bf16 %v518_v18, %v514_v17  ;;  %v524_v27 = vld [vmem:[#allocation11 + $0x4a0] sm:$0xff]  ;;  %v522_v30 = vld [vmem:[#allocation11 + $0x490] sm:$0xff] }
  0xca   :  { %1378 = vmatpush1.bf16.msra.mxu0 %v1377_v24  ;;  %v1395_v24 = vpack.c.bf16 %v501_v22, %v497_v21  ;;  %v525_v21 = vld [vmem:[#allocation11 + $0x4a8] sm:$0xff]  ;;  %v523_v22 = vld [vmem:[#allocation11 + $0x498] sm:$0xff]  ;;  %v526_v31 = vld [vmem:[#allocation11 + $0x4b0] sm:$0xff]  ;;  %v1409_v36 = vpack.c.bf16 %v524_v27, %v520_v26 }
  0xcb   :  { %1380 = vmatprep.subr.bf16.mxu0 %v1379_v41  ;;  %v2047_v41 = vshrl.u32 %v190_v40, 7  ;;  %v544_v8 = vld [vmem:[#allocation11 + $0x540] sm:$0xff]  ;;  %v565_v26 = vld [vmem:[#allocation11 + $0x5e8] sm:$0xff]  ;;  %v563_v27 = vld [vmem:[#allocation11 + $0x5d8] sm:$0xff] }
  0xcc   :  { %1506 = vmatpush1.bf16.msra.mxu1 %v1505_v37  ;;  %v1399_v37 = vpack.c.bf16 %v509_v35, %v505_v34  ;;  %v531_v34 = vld [vmem:[#allocation11 + $0x4d8] sm:$0xff] }
  0xcd   :  { %1508 = vmatprep.subr.bf16.mxu1 %v1507_v45  ;;  %v192_v42 = vsub.s32 0, %v2047_v41  ;;  %v196_v44 = vsub.s32 1, %v2047_v41  ;;  %v204_v54 = vsub.s32 3, %v2047_v41  ;;  %v535_v35 = vld [vmem:[#allocation11 + $0x4f8] sm:$0xff] }
  0xce   :  { %1382 = vmatpush1.bf16.msra.mxu0 %v1381_v46 }
  0xcf   :  { %1384 = vmatprep.subr.bf16.mxu0 %v1383_v53  ;;  %v193_v45 = vrot.slane %v2053_v43, %v192_v42  ;;  %v197_v46 = vrot.slane %v2053_v43, %v196_v44  ;;  %v205_v56 = vrot.slane %v2053_v43, %v204_v54 }
  0xd0   :  { %1510 = vmatpush1.bf16.msra.mxu1 %v1509_v49 }
  0xd1   :  { %1512 = vmatprep.subr.bf16.mxu1 %v1511_v57 }
  0xd2   :  { %1386 = vmatpush1.bf16.msra.mxu0 %v1385_v58 }
  0xd3   :  { %1388 = vmatprep.subr.bf16.mxu0 %v1387_v1  ;;  %v510_v1 = vld [vmem:[#allocation11 + $0x430] sm:$0xff] }
  0xd4   :  { %1514 = vmatpush1.bf16.msra.mxu1 %v1513_v61  ;;  %v504_v61 = vld [vmem:[#allocation11 + $0x400] sm:$0xff]  ;;  %v1529_v11 = vpack.c.bf16 %v510_v1, %v506_v0  ;;  %v538_v0 = vld [vmem:[#allocation11 + $0x510] sm:$0xff] }
  0xd5   :  { %1516 = vmatprep.subr.bf16.mxu1 %v1515_v5  ;;  %v542_v1 = vld [vmem:[#allocation11 + $0x530] sm:$0xff] }
  0xd6   :  { %1390 = vmatpush1.bf16.msra.mxu0 %v1389_v6  ;;  %v517_v6 = vld [vmem:[#allocation11 + $0x468] sm:$0xff]  ;;  %v1545_v7 = vpack.c.bf16 %v542_v1, %v538_v0  ;;  %v580_v0 = vld [vmem:[#allocation11 + $0x660] sm:$0xff] }
  0xd7   :  { %1392 = vmatprep.subr.bf16.mxu0 %v1391_v14 }
  0xd8   :  { %1518 = vmatpush1.bf16.msra.mxu1 %v1517_v10  ;;  %v1401_v10 = vpack.c.bf16 %v508_v62, %v504_v61 }
  0xd9   :  { %1520 = vmatprep.subr.bf16.mxu1 %v1519_v15  ;;  %v1403_v15 = vpack.c.bf16 %v517_v6, %v513_v2  ;;  %v545_v2 = vld [vmem:[#allocation11 + $0x548] sm:$0xff] }
  0xda   :  { %1394 = vmatpush1.bf16.msra.mxu0 %v1393_v19  ;;  %v521_v19 = vld [vmem:[#allocation11 + $0x488] sm:$0xff] }
  0xdb   :  { %1396 = vmatprep.subr.bf16.mxu0 %v1395_v24  ;;  %v1405_v24 = vpack.c.bf16 %v516_v13, %v512_v12  ;;  %v550_v12 = vld [vmem:[#allocation11 + $0x570] sm:$0xff]  ;;  %v553_v13 = vld [vmem:[#allocation11 + $0x588] sm:$0xff] }
  0xdc   :  { %1522 = vmatpush1.bf16.msra.mxu1 %v1521_v23  ;;  %v527_v23 = vld [vmem:[#allocation11 + $0x4b8] sm:$0xff] }
  0xdd   :  { %1524 = vmatprep.subr.bf16.mxu1 %v1523_v28  ;;  %v1407_v28 = vpack.c.bf16 %v525_v21, %v521_v19  ;;  %v1535_v29 = vpack.c.bf16 %v527_v23, %v523_v22  ;;  %v552_v19 = vld [vmem:[#allocation11 + $0x580] sm:$0xff]  ;;  %v554_v23 = vld [vmem:[#allocation11 + $0x590] sm:$0xff] }
  0xde   :  { %1398 = vmatpush1.bf16.msra.mxu0 %v1397_v32  ;;  %v529_v32 = vld [vmem:[#allocation11 + $0x4c8] sm:$0xff] }
  0xdf   :  { %1400 = vmatprep.subr.bf16.mxu0 %v1399_v37  ;;  %v1537_v37 = vpack.c.bf16 %v526_v31, %v522_v30  ;;  %v560_v31 = vld [vmem:[#allocation11 + $0x5c0] sm:$0xff] }
  0xe0   :  { %1526 = vmatpush1.bf16.msra.mxu1 %v1525_v33  ;;  %v533_v33 = vld [vmem:[#allocation11 + $0x4e8] sm:$0xff] }
  0xe1   :  { %1528 = vmatprep.subr.bf16.mxu1 %v1527_v39  ;;  %v532_v39 = vld [vmem:[#allocation11 + $0x4e0] sm:$0xff] }
 0x174   :  { %v276_v47 = vpop.f32.mrb[0].mxu0 }
 0x175   :  { %v277_v48 = vadd.f32 %v276_v47, %v193_v45  ;;  %v278_v49 = vpop.f32.mrb[1].mxu0  ;;  %v1411_v45 = vpack.c.bf16 %v533_v33, %v529_v32  ;;  %v530_v47 = vld [vmem:[#allocation11 + $0x4d0] sm:$0xff]  ;;  %v564_v32 = vld [vmem:[#allocation11 + $0x5e0] sm:$0xff] }
 0x176   :  { %v279_v50 = vadd.f32 %v278_v49, %v197_v46  ;;  %v2066_v57 = vpop.f32.mrb[0].mxu1  ;;  %v1539_v46 = vpack.c.bf16 %v535_v35, %v531_v34  ;;  %v537_v49 = vld [vmem:[#allocation11 + $0x508] sm:$0xff]  ;;  %v562_v35 = vld [vmem:[#allocation11 + $0x5d0] sm:$0xff] }
 0x177   :  { %v356_v51 = vmin.f32 %v277_v48, 0.0  ;;  %v349_v58 = vpop.f32.mrb[1].mxu1  ;;  %vm352_vm1 = vcmp.gt.f32.partialorder %v277_v48, 0.0 }
 0x178   :  { %v357_v52 = vmin.f32 %v279_v50, 0.0  ;;  %v2068_v59 = vadd.f32 %v349_v58, %v205_v56  ;;  %vm353_vm0 = vcmp.gt.f32.partialorder %v279_v50, 0.0  ;;  %v536_v58 = vld [vmem:[#allocation11 + $0x500] sm:$0xff] }
 0x179   :  { %v360_v53 = vmul.f32 1.442695, %v356_v51  ;;  %v539_v51 = vld [vmem:[#allocation11 + $0x518] sm:$0xff] }
 0x17a   :  { %v362_v55 = vmul.f32 1.442695, %v357_v52  ;;  %v359_v60 = vmin.f32 %v2068_v59, 0.0  ;;  %vm355_vm2 = vcmp.gt.f32.partialorder %v2068_v59, 0.0  ;;  %v543_v52 = vld [vmem:[#allocation11 + $0x538] sm:$0xff] }
 0x17b   :  { %1676 = vpow2.f32 %v360_v53 }
 0x17c   :  { %1678 = vpow2.f32 %v362_v55  ;;  %v366_v3 = vmul.f32 1.442695, %v359_v60  ;;  %v1413_v55 = vpack.c.bf16 %v532_v39, %v528_v38  ;;  %v540_v60 = vld [vmem:[#allocation11 + $0x520] sm:$0xff]  ;;  %v573_v38 = vld [vmem:[#allocation11 + $0x628] sm:$0xff]  ;;  %v571_v39 = vld [vmem:[#allocation11 + $0x618] sm:$0xff] }
 0x17d   :  { %v1417_v6 = vpack.c.bf16 %v540_v60, %v536_v58  ;;  %v579_v58 = vld [vmem:[#allocation11 + $0x658] sm:$0xff] }
 0x17e   :  { %1680 = vpow2.f32 %v366_v3  ;;  %v549_v3 = vld [vmem:[#allocation11 + $0x568] sm:$0xff]  ;;  %v583_v60 = vld [vmem:[#allocation11 + $0x678] sm:$0xff] }
 0x185   :  { %v1677_v63 = vpop.eup %1676 }
 0x186   :  { %v1679_v4 = vpop.eup %1678  ;;  %v1192_v5 = vadd.f32 -1.0, %v1677_v63  ;;  %v1543_v63 = vpack.c.bf16 %v543_v52, %v539_v51  ;;  %v570_v52 = vld [vmem:[#allocation11 + $0x610] sm:$0xff] }
 0x187   :  { %v1193_v9 = vadd.f32 -1.0, %v1679_v4  ;;  %v547_v4 = vld [vmem:[#allocation11 + $0x558] sm:$0xff] }
 0x188   :  { %v372_v20 = vsel %vm352_vm1, %v277_v48, %v1192_v5  ;;  %v1681_v40 = vpop.eup %1680  ;;  %v534_v48 = vld [vmem:[#allocation11 + $0x4f0] sm:$0xff]  ;;  %v551_v5 = vld [vmem:[#allocation11 + $0x578] sm:$0xff] }
 0x189   :  { %v373_v14 = vsel %vm353_vm0, %v279_v50, %v1193_v9  ;;  %v541_v50 = vld [vmem:[#allocation11 + $0x528] sm:$0xff]  ;;  %v1195_v53 = vadd.f32 -1.0, %v1681_v40  ;;  %v1541_v56 = vpack.c.bf16 %v534_v48, %v530_v47  ;;  %v548_v9 = vld [vmem:[#allocation11 + $0x560] sm:$0xff]  ;;  %v575_v40 = vld [vmem:[#allocation11 + $0x638] sm:$0xff] }
 0x18a   :  { %718 = vmatprep.mubr.f32.mxu0 %v373_v14  ;;  %860 = vmatprep.mubr.f32.mxu1 %v373_v14  ;;  %v1415_v62 = vpack.c.bf16 %v541_v50, %v537_v49  ;;  %v557_v14 = vld [vmem:[#allocation11 + $0x5a8] sm:$0xff]  ;;  %v1421_v17 = vpack.c.bf16 %v548_v9, %v544_v8  ;;  %v568_v47 = vld [vmem:[#allocation11 + $0x600] sm:$0xff]  ;;  %v200_v49 = vsub.s32 2, %v2047_v41  ;;  %v1559_v51 = vpack.c.bf16 %v575_v40, %v571_v39  ;;  %v587_v8 = vld [vmem:[#allocation11 + $0x698] sm:$0xff] }
 0x18b   :  { %719 = vmatmul.mubr.f32.vlgmr.msra.gmra.mrb[2].mxu0 %v372_v20  ;;  %861 = vmatmul.mubr.f32.vlgmr.msra.gmra.mrb[2].mxu1 %v372_v20  ;;  %v375_v61 = vsel %vm355_vm2, %v2068_v59, %v1195_v53  ;;  %v1419_v59 = vpack.c.bf16 %v549_v3, %v545_v2  ;;  %v556_v20 = vld [vmem:[#allocation11 + $0x5a0] sm:$0xff]  ;;  %v1423_v21 = vpack.c.bf16 %v557_v14, %v553_v13  ;;  %v574_v53 = vld [vmem:[#allocation11 + $0x630] sm:$0xff]  ;;  %v591_v9 = vld [vmem:[#allocation11 + $0x6b8] sm:$0xff] }
 0x18c   :  { %1402 = vmatpush1.bf16.msra.mxu0 %v1401_v10  ;;  %1530 = vmatpush1.bf16.msra.mxu1 %v1529_v11  ;;  %v1547_v10 = vpack.c.bf16 %v551_v5, %v547_v4  ;;  %v546_v11 = vld [vmem:[#allocation11 + $0x550] sm:$0xff]  ;;  %v572_v48 = vld [vmem:[#allocation11 + $0x620] sm:$0xff]  ;;  %v201_v1 = vrot.slane %v2053_v43, %v200_v49  ;;  %v1563_v3 = vpack.c.bf16 %v583_v60, %v579_v58 }
 0x18d   :  { %1404 = vmatprep.subr.bf16.mxu0 %v1403_v15  ;;  %1532 = vmatprep.subr.bf16.mxu1 %v1531_v16  ;;  %v555_v15 = vld [vmem:[#allocation11 + $0x598] sm:$0xff]  ;;  %v1549_v18 = vpack.c.bf16 %v550_v12, %v546_v11  ;;  %v578_v4 = vld [vmem:[#allocation11 + $0x650] sm:$0xff]  ;;  %v584_v11 = vld [vmem:[#allocation11 + $0x680] sm:$0xff]  ;;  %v1567_v14 = vpack.c.bf16 %v591_v9, %v587_v8 }
 0x18e   :  { %789 = vmatprep.mubr.f32.mxu0 %v375_v61  ;;  %931 = vmatprep.mubr.f32.mxu1 %v375_v61  ;;  %v559_v16 = vld [vmem:[#allocation11 + $0x5b8] sm:$0xff]  ;;  %v1433_v61 = vpack.c.bf16 %v572_v48, %v568_v47  ;;  %v582_v5 = vld [vmem:[#allocation11 + $0x670] sm:$0xff]  ;;  %v588_v12 = vld [vmem:[#allocation11 + $0x6a0] sm:$0xff]  ;;  %v2078_v13 = vadd.f32 %v2066_v57, %v201_v1 }
 0x18f   :  { %v1551_v22 = vpack.c.bf16 %v559_v16, %v555_v15  ;;  %v586_v15 = vld [vmem:[#allocation11 + $0x690] sm:$0xff]  ;;  %v613_v47 = vld [vmem:[#allocation11 + $0x768] sm:$0xff]  ;;  %v611_v48 = vld [vmem:[#allocation11 + $0x758] sm:$0xff] }
 0x190   :  { %1406 = vmatpush1.bf16.msra.mxu0 %v1405_v24  ;;  %1534 = vmatpush1.bf16.msra.mxu1 %v1533_v25  ;;  %v558_v24 = vld [vmem:[#allocation11 + $0x5b0] sm:$0xff]  ;;  %v561_v25 = vld [vmem:[#allocation11 + $0x5c8] sm:$0xff]  ;;  %v623_v1 = vld [vmem:[#allocation11 + $0x7b8] sm:$0xff]  ;;  %vm354_vm3 = vcmp.gt.f32.partialorder %v2078_v13, 0.0 }
 0x191   :  { %1408 = vmatprep.subr.bf16.mxu0 %v1407_v28  ;;  %1536 = vmatprep.subr.bf16.mxu1 %v1535_v29  ;;  %v567_v28 = vld [vmem:[#allocation11 + $0x5f8] sm:$0xff]  ;;  %v1425_v29 = vpack.c.bf16 %v556_v20, %v552_v19  ;;  %v1553_v30 = vpack.c.bf16 %v558_v24, %v554_v23  ;;  %v1427_v33 = vpack.c.bf16 %v565_v26, %v561_v25  ;;  %v590_v16 = vld [vmem:[#allocation11 + $0x6b0] sm:$0xff]  ;;  %v592_v23 = vld [vmem:[#allocation11 + $0x6c0] sm:$0xff]  ;;  %v358_v25 = vmin.f32 %v2078_v13, 0.0 }
 0x192   :  { %v1555_v34 = vpack.c.bf16 %v567_v28, %v563_v27  ;;  %v595_v19 = vld [vmem:[#allocation11 + $0x6d8] sm:$0xff]  ;;  %v596_v24 = vld [vmem:[#allocation11 + $0x6e0] sm:$0xff]  ;;  %v594_v27 = vld [vmem:[#allocation11 + $0x6d0] sm:$0xff] }
 0x193   :  { %v599_v20 = vld [vmem:[#allocation11 + $0x6f8] sm:$0xff]  ;;  %v598_v28 = vld [vmem:[#allocation11 + $0x6f0] sm:$0xff] }
 0x194   :  { %1410 = vmatpush1.bf16.msra.mxu0 %v1409_v36  ;;  %1538 = vmatpush1.bf16.msra.mxu1 %v1537_v37  ;;  %v566_v36 = vld [vmem:[#allocation11 + $0x5f0] sm:$0xff]  ;;  %v569_v37 = vld [vmem:[#allocation11 + $0x608] sm:$0xff]  ;;  %v1571_v26 = vpack.c.bf16 %v599_v20, %v595_v19 }
 0x195   :  { %1412 = vmatprep.subr.bf16.mxu0 %v1411_v45  ;;  %1540 = vmatprep.subr.bf16.mxu1 %v1539_v46  ;;  %v1429_v45 = vpack.c.bf16 %v564_v32, %v560_v31  ;;  %v1557_v46 = vpack.c.bf16 %v566_v36, %v562_v35  ;;  %v1431_v50 = vpack.c.bf16 %v573_v38, %v569_v37  ;;  %v603_v31 = vld [vmem:[#allocation11 + $0x718] sm:$0xff]  ;;  %v600_v35 = vld [vmem:[#allocation11 + $0x700] sm:$0xff]  ;;  %v364_v37 = vmul.f32 1.442695, %v358_v25  ;;  %v602_v40 = vld [vmem:[#allocation11 + $0x710] sm:$0xff] }
 0x196   :  { %v607_v32 = vld [vmem:[#allocation11 + $0x738] sm:$0xff]  ;;  %v604_v36 = vld [vmem:[#allocation11 + $0x720] sm:$0xff]  ;;  %v610_v60 = vld [vmem:[#allocation11 + $0x750] sm:$0xff] }
 0x197   :  { %v1575_v39 = vpack.c.bf16 %v607_v32, %v603_v31  ;;  %1682 = vpow2.f32 %v364_v37  ;;  %v618_v8 = vld [vmem:[#allocation11 + $0x790] sm:$0xff]  ;;  %v994_v31 = vld [vmem:[#allocation13 + $0x100] sm:$0xff]  ;;  %v995_v32 = vld [vmem:[#allocation13 + $0x108] sm:$0xff] }
 0x198   :  { %1414 = vmatpush1.bf16.msra.mxu0 %v1413_v55  ;;  %1542 = vmatpush1.bf16.msra.mxu1 %v1541_v56  ;;  %v577_v55 = vld [vmem:[#allocation11 + $0x648] sm:$0xff]  ;;  %v622_v9 = vld [vmem:[#allocation11 + $0x7b0] sm:$0xff]  ;;  %v1013_v37 = vld [vmem:[#allocation13 + $0x198] sm:$0xff] }
 0x199   :  { %1416 = vmatprep.subr.bf16.mxu0 %v1415_v62  ;;  %1544 = vmatprep.subr.bf16.mxu1 %v1543_v63  ;;  %v581_v56 = vld [vmem:[#allocation11 + $0x668] sm:$0xff]  ;;  %v1561_v62 = vpack.c.bf16 %v574_v53, %v570_v52  ;;  %v576_v63 = vld [vmem:[#allocation11 + $0x640] sm:$0xff]  ;;  %v626_v19 = vld [vmem:[#allocation11 + $0x7d0] sm:$0xff] }
 0x19a   :  { %v1435_v2 = vpack.c.bf16 %v581_v56, %v577_v55  ;;  %v608_v53 = vld [vmem:[#allocation11 + $0x740] sm:$0xff]  ;;  %v630_v20 = vld [vmem:[#allocation11 + $0x7f0] sm:$0xff] }
 0x19b   :  { %v612_v55 = vld [vmem:[#allocation11 + $0x760] sm:$0xff] }
 0x19c   :  { %1418 = vmatpush1.bf16.msra.mxu0 %v1417_v6  ;;  %1546 = vmatpush1.bf16.msra.mxu1 %v1545_v7  ;;  %v585_v6 = vld [vmem:[#allocation11 + $0x688] sm:$0xff] }
 0x19d   :  { %1420 = vmatprep.subr.bf16.mxu0 %v1419_v59  ;;  %1548 = vmatprep.subr.bf16.mxu1 %v1547_v10  ;;  %v589_v7 = vld [vmem:[#allocation11 + $0x6a8] sm:$0xff]  ;;  %v1437_v59 = vpack.c.bf16 %v580_v0, %v576_v63  ;;  %v1565_v10 = vpack.c.bf16 %v582_v5, %v578_v4  ;;  %v619_v0 = vld [vmem:[#allocation11 + $0x798] sm:$0xff]  ;;  %v616_v4 = vld [vmem:[#allocation11 + $0x780] sm:$0xff] }
 0x19e   :  { %v1439_v43 = vpack.c.bf16 %v589_v7, %v585_v6  ;;  %v621_v63 = vld [vmem:[#allocation11 + $0x7a8] sm:$0xff]  ;;  %v620_v5 = vld [vmem:[#allocation11 + $0x7a0] sm:$0xff]  ;;  %v1583_v7 = vpack.c.bf16 %v623_v1, %v619_v0 }
 0x19f   :  { %v967_v0 = vld [vmem:[#allocation13 + $0x28] sm:$0xff] }
 0x1a0   :  { %1422 = vmatpush1.bf16.msra.mxu0 %v1421_v17  ;;  %1550 = vmatpush1.bf16.msra.mxu1 %v1549_v18  ;;  %v593_v17 = vld [vmem:[#allocation11 + $0x6c8] sm:$0xff] }
 0x1a1   :  { %1424 = vmatprep.subr.bf16.mxu0 %v1423_v21  ;;  %1552 = vmatprep.subr.bf16.mxu1 %v1551_v22  ;;  %v597_v18 = vld [vmem:[#allocation11 + $0x6e8] sm:$0xff]  ;;  %v1441_v21 = vpack.c.bf16 %v588_v12, %v584_v11  ;;  %v1569_v22 = vpack.c.bf16 %v590_v16, %v586_v15  ;;  %v627_v11 = vld [vmem:[#allocation11 + $0x7d8] sm:$0xff]  ;;  %v624_v15 = vld [vmem:[#allocation11 + $0x7c0] sm:$0xff]  ;;  %v1683_v25 = vpop.eup %1682 }
 0x1a2   :  { %v1443_v57 = vpack.c.bf16 %v597_v18, %v593_v17  ;;  %v631_v12 = vld [vmem:[#allocation11 + $0x7f8] sm:$0xff]  ;;  %v628_v16 = vld [vmem:[#allocation11 + $0x7e0] sm:$0xff] }
 0x1a3   :  { %v1587_v18 = vpack.c.bf16 %v631_v12, %v627_v11  ;;  %v1000_v12 = vld [vmem:[#allocation13 + $0x130] sm:$0xff] }
 0x1a4   :  { %1426 = vmatpush1.bf16.msra.mxu0 %v1425_v29  ;;  %1554 = vmatpush1.bf16.msra.mxu1 %v1553_v30  ;;  %v601_v29 = vld [vmem:[#allocation11 + $0x708] sm:$0xff] }
 0x1a5   :  { %1428 = vmatprep.subr.bf16.mxu0 %v1427_v33  ;;  %1556 = vmatprep.subr.bf16.mxu1 %v1555_v34  ;;  %v605_v30 = vld [vmem:[#allocation11 + $0x728] sm:$0xff]  ;;  %v1445_v33 = vpack.c.bf16 %v596_v24, %v592_v23  ;;  %v1573_v34 = vpack.c.bf16 %v598_v28, %v594_v27  ;;  %v1010_v23 = vld [vmem:[#allocation13 + $0x180] sm:$0xff] }
 0x1a6   :  { %v1447_v38 = vpack.c.bf16 %v605_v30, %v601_v29  ;;  %v1011_v24 = vld [vmem:[#allocation13 + $0x188] sm:$0xff]  ;;  %v962_v27 = vld [vmem:[#allocation13] sm:$0xff] }
 0x1a7   :  { %v963_v28 = vld [vmem:[#allocation13 + $0x8] sm:$0xff]  ;;  %v1623_v30 = vpack.c.bf16 %v1011_v24, %v1010_v23  ;;  %v1002_v24 = vld [vmem:[#allocation13 + $0x140] sm:$0xff] }
 0x1a8   :  { %1430 = vmatpush1.bf16.msra.mxu0 %v1429_v45  ;;  %1558 = vmatpush1.bf16.msra.mxu1 %v1557_v46  ;;  %v606_v45 = vld [vmem:[#allocation11 + $0x730] sm:$0xff]  ;;  %v609_v46 = vld [vmem:[#allocation11 + $0x748] sm:$0xff] }
 0x1a9   :  { %1432 = vmatprep.subr.bf16.mxu0 %v1431_v50  ;;  %1560 = vmatprep.subr.bf16.mxu1 %v1559_v51  ;;  %v615_v50 = vld [vmem:[#allocation11 + $0x778] sm:$0xff]  ;;  %v1449_v51 = vpack.c.bf16 %v604_v36, %v600_v35  ;;  %v1577_v52 = vpack.c.bf16 %v606_v45, %v602_v40  ;;  %v1451_v56 = vpack.c.bf16 %v613_v47, %v609_v46  ;;  %v1012_v36 = vld [vmem:[#allocation13 + $0x190] sm:$0xff] }
 0x1aa   :  { %v1579_v58 = vpack.c.bf16 %v615_v50, %v611_v48  ;;  %v981_v35 = vld [vmem:[#allocation13 + $0x98] sm:$0xff]  ;;  %v964_v40 = vld [vmem:[#allocation13 + $0x10] sm:$0xff]  ;;  %v1627_v47 = vpack.c.bf16 %v1013_v37, %v1012_v36  ;;  %v990_v37 = vld [vmem:[#allocation13 + $0xe0] sm:$0xff] }
 0x1ab   :  { %v965_v45 = vld [vmem:[#allocation13 + $0x18] sm:$0xff]  ;;  %v996_v48 = vld [vmem:[#allocation13 + $0x110] sm:$0xff] }
 0x1ac   :  { %1434 = vmatpush1.bf16.msra.mxu0 %v1433_v61  ;;  %1562 = vmatpush1.bf16.msra.mxu1 %v1561_v62  ;;  %v614_v61 = vld [vmem:[#allocation11 + $0x770] sm:$0xff]  ;;  %v617_v62 = vld [vmem:[#allocation11 + $0x788] sm:$0xff]  ;;  %v997_v50 = vld [vmem:[#allocation13 + $0x118] sm:$0xff] }
 0x1ad   :  { %1436 = vmatprep.subr.bf16.mxu0 %v1435_v2  ;;  %1564 = vmatprep.subr.bf16.mxu1 %v1563_v3  ;;  %v1453_v2 = vpack.c.bf16 %v612_v55, %v608_v53  ;;  %v1581_v3 = vpack.c.bf16 %v614_v61, %v610_v60  ;;  %v1455_v6 = vpack.c.bf16 %v621_v63, %v617_v62  ;;  %v983_v53 = vld [vmem:[#allocation13 + $0xa8] sm:$0xff]  ;;  %v1014_v55 = vld [vmem:[#allocation13 + $0x1a0] sm:$0xff]  ;;  %v1005_v36 = vld [vmem:[#allocation13 + $0x158] sm:$0xff] }
 0x1ae   :  { %v1629_v60 = vpack.c.bf16 %v997_v50, %v996_v48  ;;  %v966_v63 = vld [vmem:[#allocation13 + $0x20] sm:$0xff]  ;;  %v975_v50 = vld [vmem:[#allocation13 + $0x68] sm:$0xff] }
 0x1af   :  { %v1601_v1 = vpack.c.bf16 %v967_v0, %v966_v63  ;;  %v974_v48 = vld [vmem:[#allocation13 + $0x60] sm:$0xff]  ;;  %v976_v63 = vld [vmem:[#allocation13 + $0x70] sm:$0xff] }
 0x1b0   :  { %1438 = vmatpush1.bf16.msra.mxu0 %v1437_v59  ;;  %1566 = vmatpush1.bf16.msra.mxu1 %v1565_v10  ;;  %v625_v59 = vld [vmem:[#allocation11 + $0x7c8] sm:$0xff] }
 0x1b1   :  { %1440 = vmatprep.subr.bf16.mxu0 %v1439_v43  ;;  %1568 = vmatprep.subr.bf16.mxu1 %v1567_v14  ;;  %v629_v10 = vld [vmem:[#allocation11 + $0x7e8] sm:$0xff]  ;;  %v1457_v43 = vpack.c.bf16 %v620_v5, %v616_v4  ;;  %v1585_v14 = vpack.c.bf16 %v622_v9, %v618_v8  ;;  %v984_v4 = vld [vmem:[#allocation13 + $0xb0] sm:$0xff]  ;;  %v985_v5 = vld [vmem:[#allocation13 + $0xb8] sm:$0xff] }
 0x1b2   :  { %v1459_v17 = vpack.c.bf16 %v629_v10, %v625_v59  ;;  %v1017_v8 = vld [vmem:[#allocation13 + $0x1b8] sm:$0xff]  ;;  %v968_v9 = vld [vmem:[#allocation13 + $0x30] sm:$0xff] }
 0x1b3   :  { %v969_v59 = vld [vmem:[#allocation13 + $0x38] sm:$0xff] }
 0x1b4   :  { %1442 = vmatpush1.bf16.msra.mxu0 %v1441_v21  ;;  %1570 = vmatpush1.bf16.msra.mxu1 %v1569_v22  ;;  %v978_v21 = vld [vmem:[#allocation13 + $0x80] sm:$0xff]  ;;  %v979_v22 = vld [vmem:[#allocation13 + $0x88] sm:$0xff]  ;;  %v1605_v11 = vpack.c.bf16 %v969_v59, %v968_v9 }
 0x1b5   :  { %1444 = vmatprep.subr.bf16.mxu0 %v1443_v57  ;;  %1572 = vmatprep.subr.bf16.mxu1 %v1571_v26  ;;  %v1461_v57 = vpack.c.bf16 %v628_v16, %v624_v15  ;;  %v1589_v26 = vpack.c.bf16 %v630_v20, %v626_v19  ;;  %v1591_v29 = vpack.c.bf16 %v979_v22, %v978_v21  ;;  %v986_v15 = vld [vmem:[#allocation13 + $0xc0] sm:$0xff]  ;;  %v987_v16 = vld [vmem:[#allocation13 + $0xc8] sm:$0xff] }
 0x1b6   :  { %v1019_v19 = vld [vmem:[#allocation13 + $0x1c8] sm:$0xff]  ;;  %v970_v20 = vld [vmem:[#allocation13 + $0x40] sm:$0xff] }
 0x1b7   :  { %v971_v21 = vld [vmem:[#allocation13 + $0x48] sm:$0xff] }
 0x1b8   :  { %1446 = vmatpush1.bf16.msra.mxu0 %v1445_v33  ;;  %1574 = vmatpush1.bf16.msra.mxu1 %v1573_v34  ;;  %v980_v33 = vld [vmem:[#allocation13 + $0x90] sm:$0xff]  ;;  %v1194_v34 = vadd.f32 -1.0, %v1683_v25  ;;  %v1609_v23 = vpack.c.bf16 %v971_v21, %v970_v20  ;;  %v1003_v25 = vld [vmem:[#allocation13 + $0x148] sm:$0xff] }
 0x1b9   :  { %1448 = vmatprep.subr.bf16.mxu0 %v1447_v38  ;;  %1576 = vmatprep.subr.bf16.mxu1 %v1575_v39  ;;  %v1593_v38 = vpack.c.bf16 %v963_v28, %v962_v27  ;;  %v1625_v39 = vpack.c.bf16 %v995_v32, %v994_v31  ;;  %v1595_v46 = vpack.c.bf16 %v981_v35, %v980_v33  ;;  %v989_v27 = vld [vmem:[#allocation13 + $0xd8] sm:$0xff]  ;;  %v1020_v28 = vld [vmem:[#allocation13 + $0x1d0] sm:$0xff] }
 0x1ba   :  { %v972_v31 = vld [vmem:[#allocation13 + $0x50] sm:$0xff]  ;;  %v973_v32 = vld [vmem:[#allocation13 + $0x58] sm:$0xff] }
 0x1bb   :  { %v1004_v35 = vld [vmem:[#allocation13 + $0x150] sm:$0xff] }
 0x1bc   :  { %1450 = vmatpush1.bf16.msra.mxu0 %v1449_v51  ;;  %1578 = vmatpush1.bf16.msra.mxu1 %v1577_v52  ;;  %v982_v51 = vld [vmem:[#allocation13 + $0xa0] sm:$0xff]  ;;  %v374_v52 = vsel %vm354_vm3, %v2078_v13, %v1194_v34  ;;  %v1613_v34 = vpack.c.bf16 %v973_v32, %v972_v31 }
 0x1bd   :  { %1452 = vmatprep.subr.bf16.mxu0 %v1451_v56  ;;  %1580 = vmatprep.subr.bf16.mxu1 %v1579_v58  ;;  %v1015_v56 = vld [vmem:[#allocation13 + $0x1a8] sm:$0xff]  ;;  %v1597_v58 = vpack.c.bf16 %v965_v45, %v964_v40  ;;  %v1599_v61 = vpack.c.bf16 %v983_v53, %v982_v51  ;;  %v998_v13 = vld [vmem:[#allocation13 + $0x120] sm:$0xff] }
 0x1be   :  { %v1631_v62 = vpack.c.bf16 %v1015_v56, %v1014_v55  ;;  %v1022_v40 = vld [vmem:[#allocation13 + $0x1e0] sm:$0xff]  ;;  %v1023_v45 = vld [vmem:[#allocation13 + $0x1e8] sm:$0xff]  ;;  %v992_v55 = vld [vmem:[#allocation13 + $0xf0] sm:$0xff] }
 0x1bf   :  { %v1006_v51 = vld [vmem:[#allocation13 + $0x160] sm:$0xff]  ;;  %v1007_v53 = vld [vmem:[#allocation13 + $0x168] sm:$0xff]  ;;  %v993_v56 = vld [vmem:[#allocation13 + $0xf8] sm:$0xff] }
 0x1c0   :  { %1454 = vmatpush1.bf16.msra.mxu0 %v1453_v2  ;;  %1582 = vmatpush1.bf16.msra.mxu1 %v1581_v3  ;;  %v999_v2 = vld [vmem:[#allocation13 + $0x128] sm:$0xff] }
 0x1c1   :  { %1456 = vmatprep.subr.bf16.mxu0 %v1455_v6  ;;  %1584 = vmatprep.subr.bf16.mxu1 %v1583_v7  ;;  %v1633_v3 = vpack.c.bf16 %v999_v2, %v998_v13  ;;  %v1016_v6 = vld [vmem:[#allocation13 + $0x1b0] sm:$0xff]  ;;  %v1603_v7 = vpack.c.bf16 %v985_v5, %v984_v4  ;;  %v977_v13 = vld [vmem:[#allocation13 + $0x78] sm:$0xff] }
 0x1c2   :  { %v1635_v10 = vpack.c.bf16 %v1017_v8, %v1016_v6  ;;  %v1009_v2 = vld [vmem:[#allocation13 + $0x178] sm:$0xff]  ;;  %v632_v5 = vld [vmem:[%s2116_s7] sm:$0xf] }
 0x1c3   :  { %v637_v6 = vrot.slane %v632_v5, %v192_v42  ;;  %v641_v8 = vrot.slane %v632_v5, %v196_v44  ;;  %v649_v9 = vrot.slane %v632_v5, %v204_v54 }
 0x1c4   :  { %1458 = vmatpush1.bf16.msra.mxu0 %v1457_v43  ;;  %1586 = vmatpush1.bf16.msra.mxu1 %v1585_v14  ;;  %v1001_v43 = vld [vmem:[#allocation13 + $0x138] sm:$0xff] }
 0x1c5   :  { %1460 = vmatprep.subr.bf16.mxu0 %v1459_v17  ;;  %1588 = vmatprep.subr.bf16.mxu1 %v1587_v18  ;;  %v1637_v14 = vpack.c.bf16 %v1001_v43, %v1000_v12  ;;  %v1018_v17 = vld [vmem:[#allocation13 + $0x1c0] sm:$0xff]  ;;  %v1607_v18 = vpack.c.bf16 %v987_v16, %v986_v15 }
 0x1c6   :  { %v1639_v22 = vpack.c.bf16 %v1019_v19, %v1018_v17 }
 0x1c8   :  { %1462 = vmatpush1.bf16.msra.mxu0 %v1461_v57  ;;  %1590 = vmatpush1.bf16.msra.mxu1 %v1589_v26  ;;  %v1641_v57 = vpack.c.bf16 %v1003_v25, %v1002_v24  ;;  %v988_v26 = vld [vmem:[#allocation13 + $0xd0] sm:$0xff] }
 0x1c9   :  { %1592 = vmatprep.subr.bf16.mxu0 %v1591_v29  ;;  %1624 = vmatprep.subr.bf16.mxu1 %v1623_v30  ;;  %v1611_v29 = vpack.c.bf16 %v989_v27, %v988_v26  ;;  %v1021_v30 = vld [vmem:[#allocation13 + $0x1d8] sm:$0xff] }
 0x1ca   :  { %v1643_v33 = vpack.c.bf16 %v1021_v30, %v1020_v28 }
 0x1cb   :  { %790 = vmatmul.mubr.f32.vlgmr.msra.gmra.mrb[2].mxu0 %v374_v52  ;;  %932 = vmatmul.mubr.f32.vlgmr.msra.gmra.mrb[2].mxu1 %v374_v52  ;;  %v1617_v52 = vpack.c.bf16 %v975_v50, %v974_v48 }
 0x1cc   :  { %1594 = vmatpush3.bf16.msra.mxu0 %v1593_v38  ;;  %1626 = vmatpush3.bf16.msra.mxu1 %v1625_v39  ;;  %v1645_v38 = vpack.c.bf16 %v1005_v36, %v1004_v35  ;;  %v991_v39 = vld [vmem:[#allocation13 + $0xe8] sm:$0xff] }
 0x1cd   :  { %1596 = vmatprep.subr.bf16.mxu0 %v1595_v46  ;;  %1628 = vmatprep.subr.bf16.mxu1 %v1627_v47  ;;  %v1615_v46 = vpack.c.bf16 %v991_v39, %v990_v37  ;;  %v1647_v47 = vpack.c.bf16 %v1023_v45, %v1022_v40 }
 0x1d0   :  { %1598 = vmatpush3.bf16.msra.mxu0 %v1597_v58  ;;  %1630 = vmatpush3.bf16.msra.mxu1 %v1629_v60  ;;  %v1649_v58 = vpack.c.bf16 %v1007_v53, %v1006_v51  ;;  %v1619_v60 = vpack.c.bf16 %v993_v56, %v992_v55 }
 0x1d1   :  { %1600 = vmatprep.subr.bf16.mxu0 %v1599_v61  ;;  %1632 = vmatprep.subr.bf16.mxu1 %v1631_v62  ;;  %v1024_v61 = vld [vmem:[#allocation13 + $0x1f0] sm:$0xff]  ;;  %v1025_v62 = vld [vmem:[#allocation13 + $0x1f8] sm:$0xff] }
 0x1d2   :  { %v1651_v0 = vpack.c.bf16 %v1025_v62, %v1024_v61 }
 0x1d4   :  { %1602 = vmatpush3.bf16.msra.mxu0 %v1601_v1  ;;  %1634 = vmatpush3.bf16.msra.mxu1 %v1633_v3  ;;  %v1008_v1 = vld [vmem:[#allocation13 + $0x170] sm:$0xff]  ;;  %v1621_v3 = vpack.c.bf16 %v977_v13, %v976_v63 }
 0x1d5   :  { %1604 = vmatprep.subr.bf16.mxu0 %v1603_v7  ;;  %1636 = vmatprep.subr.bf16.mxu1 %v1635_v10  ;;  %v1653_v4 = vpack.c.bf16 %v1009_v2, %v1008_v1  ;;  %v645_v7 = vrot.slane %v632_v5, %v200_v49 }
 0x1d8   :  { %1606 = vmatpush3.bf16.msra.mxu0 %v1605_v11  ;;  %1638 = vmatpush3.bf16.msra.mxu1 %v1637_v14 }
 0x1d9   :  { %1608 = vmatprep.subr.bf16.mxu0 %v1607_v18  ;;  %1640 = vmatprep.subr.bf16.mxu1 %v1639_v22 }
 0x1dc   :  { %1610 = vmatpush3.bf16.msra.mxu0 %v1609_v23  ;;  %1642 = vmatpush3.bf16.msra.mxu1 %v1641_v57 }
 0x1dd   :  { %1612 = vmatprep.subr.bf16.mxu0 %v1611_v29  ;;  %1644 = vmatprep.subr.bf16.mxu1 %v1643_v33  ;;  %v1200_v33 = vld [vmem:[%s2118_s9] ss:$0 sm:$0xff] }
 0x1e0   :  { %1614 = vmatpush3.bf16.msra.mxu0 %v1613_v34  ;;  %1646 = vmatpush3.bf16.msra.mxu1 %v1645_v38 }
 0x1e1   :  { %1616 = vmatprep.subr.bf16.mxu0 %v1615_v46  ;;  %1648 = vmatprep.subr.bf16.mxu1 %v1647_v47 }
 0x1e4   :  { %1618 = vmatpush3.bf16.msra.mxu0 %v1617_v52  ;;  %1650 = vmatpush3.bf16.msra.mxu1 %v1649_v58 }
 0x1e5   :  { %1620 = vmatprep.subr.bf16.mxu0 %v1619_v60  ;;  %1652 = vmatprep.subr.bf16.mxu1 %v1651_v0 }
 0x1e8   :  { %1622 = vmatpush3.bf16.msra.mxu0 %v1621_v3  ;;  %1654 = vmatpush3.bf16.msra.mxu1 %v1653_v4 }
 0x29e   :  { %v791_v59 = vpop.f32.mrb[2].mxu0  ;;  %v933_v10 = vpop.f32.mrb[2].mxu1 }
 0x29f   :  { %v1655_v11 = vadd.f32 %v791_v59, %v637_v6  ;;  %v1657_v12 = vadd.f32 %v933_v10, %v645_v7  ;;  %v793_v43 = vpop.f32.mrb[3].mxu0  ;;  %v935_v14 = vpop.f32.mrb[3].mxu1 }
 0x2a0   :  { %v1656_v15 = vadd.f32 %v793_v43, %v641_v8  ;;  %v1658_v16 = vadd.f32 %v935_v14, %v649_v9 }
 0x2a1   :  { %v942_v17 = vmin.f32 %v1655_v11, 0.0  ;;  %v944_v18 = vmin.f32 %v1657_v12, 0.0  ;;  %vm938_vm5 = vcmp.gt.f32.partialorder %v1655_v11, 0.0  ;;  %vm940_vm7 = vcmp.gt.f32.partialorder %v1657_v12, 0.0 }
 0x2a2   :  { %v943_v42 = vmin.f32 %v1656_v15, 0.0  ;;  %v945_v19 = vmin.f32 %v1658_v16, 0.0  ;;  %vm939_vm4 = vcmp.gt.f32.partialorder %v1656_v15, 0.0  ;;  %vm941_vm6 = vcmp.gt.f32.partialorder %v1658_v16, 0.0 }
 0x2a3   :  { %v946_v20 = vmul.f32 1.442695, %v942_v17  ;;  %v950_v49 = vmul.f32 1.442695, %v944_v18 }
 0x2a4   :  { %v948_v21 = vmul.f32 1.442695, %v943_v42  ;;  %v952_v22 = vmul.f32 1.442695, %v945_v19 }
 0x2a5   :  { %1684 = vpow2.f32 %v946_v20 }
 0x2a6   :  { %1686 = vpow2.f32 %v950_v49 }
 0x2a7   :  { %1688 = vpow2.f32 %v948_v21 }
 0x2a8   :  { %1690 = vpow2.f32 %v952_v22 }
 0x2af   :  { %v1685_v41 = vpop.eup %1684 }
 0x2b0   :  { %v1687_v44 = vpop.eup %1686  ;;  %v1196_v23 = vadd.f32 -1.0, %v1685_v41 }
 0x2b1   :  { %v1689_v54 = vpop.eup %1688  ;;  %v1198_v57 = vadd.f32 -1.0, %v1687_v44 }
 0x2b2   :  { %v1691_v24 = vpop.eup %1690  ;;  %v1197_v25 = vadd.f32 -1.0, %v1689_v54  ;;  %v958_v29 = vsel %vm938_vm5, %v1655_v11, %v1196_v23 }
 0x2b3   :  { %v1199_v26 = vadd.f32 -1.0, %v1691_v24  ;;  %v960_v30 = vsel %vm940_vm7, %v1657_v12, %v1198_v57 }
 0x2b4   :  { %v959_v27 = vsel %vm939_vm4, %v1656_v15, %v1197_v25 }
 0x2b5   :  { %1097 = vmatprep.mubr.f32.mxu0 %v959_v27  ;;  %v961_v28 = vsel %vm941_vm6, %v1658_v16, %v1199_v26 }
 0x2b6   :  { %1167 = vmatprep.mubr.f32.mxu1 %v961_v28  ;;  %1098 = vmatmul.mubr.f32.vlgmr.msra.gmra.mrb[4].mxu0 %v958_v29 }
 0x2b7   :  { %1168 = vmatmul.mubr.f32.vlgmr.msra.gmra.mrb[4].mxu1 %v960_v30 }
 0x389   :  { %v1233_v31 = vpop.f32.mrb[4].mxu0 }
 0x38a   :  { %v1268_v32 = vpop.f32.mrb[4].mxu1  ;;  %v1234_v34 = vpop.f32.mrb[5].mxu0 }
 0x38b   :  { %v1235_v35 = vadd.f32 %v1234_v34, %v1233_v31  ;;  %v1269_v36 = vpop.f32.mrb[5].mxu1 }
 0x38c   :  { %v1270_v37 = vadd.f32 %v1269_v36, %v1268_v32 }
 0x38d   :  { %v1100_v38 = vadd.f32 %v1235_v35, %v1200_v33 }
 0x38f   :  { %v1170_v39 = vadd.f32 %v1270_v37, %v1100_v38 }
 0x391   :  { %1173 = vst [vmem:[#allocation14] sm:$0xff] %v1170_v39 }
 0x392   :  { %1857 = shalt.err (!%p1854_p4)
}
 0x393   :  { %s1858_s9 = scalar_lea.hbm %s2119_s10, 128 }
 0x394   :  { %p1859_p5 = scmp.ne.s32.totalorder %s2119_s10, %s1858_s9  ;;  %p1862_p6 = scmp.lt.u32.totalorder %s1858_s9, %s2119_s10 }
 0x396   :  { %p1864_p7 = pnand %p1862_p6, %p1859_p5 }
 0x398   :  { %1867 = shalt.err (!%p1864_p7)
}
 0x399   :  { %1183 = dma.vmem_to_hbm [thread:$0]  %s1181_s1, 128, %s2119_s10, [#allocation4]  }
 0x39a   :  { %1876 = dma.done.wait [#allocation4], 128  }
 0x39b   :  { %1877 = vsyncadd [#allocation4], 4294967168 }
 0x39c   :  { %1187 = vsyncpa [#allocation3], 1 }
 0x39d   :  { %1188 = vsyncpa [#allocation6], 1 }
 0x39e   :  { %1189 = vsyncpa [#allocation9], 1 }
 0x39f   :  { %1190 = vsyncpa [#allocation12], 1 }
 0x3a0   :  { %1191 = vsyncpa [#allocation4], 1 }

</bundles_post_ra>
